<compile_context>
chip_gen: v5e
topology: v5e:2x2
jax: 0.10.0
libtpu: 0.0.40
codegen_flags: <defaults>
</compile_context>

<pallas_src>
import functools

import jax
import jax.numpy as jnp
from jax import lax
from jax.experimental import pallas as pl
from jax.experimental.pallas import tpu as pltpu


def _conv_bn_lrelu_kernel(x_ref, w_ref, b_ref, o_ref, col_ref, *, negative_slope):
    # x_ref  : (1, TH+KH-1, W+2p, Cin)  bf16  one padded row band (incl. halo rows)
    # w_ref  : (KH*KW*Cin, Cout)        bf16  BN-folded conv weights, im2col order
    # b_ref  : (1, Cout)                f32   BN-folded bias
    # o_ref  : (1, Cout, TH*Wo)         f32   output band, channel-major (lane dense)
    # col_ref: (TH, Wo, KH*KW*Cin)      bf16  VMEM im2col scratch
    TH, Wo, KKC = col_ref.shape
    Cin = x_ref.shape[-1]
    KH = x_ref.shape[1] - TH + 1
    KW = x_ref.shape[2] - Wo + 1

    # Build the im2col patch matrix in VMEM with static slice copies
    # (no per-tap reshape / relayout of strided windows).
    for dy in range(KH):
        for dx in range(KW):
            t = dy * KW + dx
            col_ref[:, :, t * Cin:(t + 1) * Cin] = x_ref[0, dy:dy + TH, dx:dx + Wo, :]

    # Single fat MXU matmul: (TH*Wo, KH*KW*Cin) @ (KH*KW*Cin, Cout),
    # bf16 operands, f32 accumulation. The reshape only merges leading dims.
    col = col_ref[...].reshape(TH * Wo, KKC)
    acc = jnp.dot(col, w_ref[...], preferred_element_type=jnp.float32)

    acc = acc + b_ref[...]                         # conv bias + BN shift (folded)
    acc = jnp.maximum(acc, negative_slope * acc)   # LeakyReLU(0.2)

    # Store channel-major so the output's last dim (TH*Wo, multiple of 128) is
    # lane dense; the wrapper's NCHW output is then a free reshape.
    o_ref[0] = acc.T.astype(o_ref.dtype)


def conv_block(x, w, b, gamma, beta, running_mean, running_var,
               *, eps=1e-5, padding=1, negative_slope=0.2, row_tile=8):
    """Fused Conv2d(k, stride=1, padding) + BatchNorm2d(eval) + LeakyReLU(0.2).

    x: (N, Cin, H, W) NCHW; w: (Cout, Cin, KH, KW) OIHW. Returns NCHW f32.
    """
    N, Cin, H, W = x.shape
    Cout, _, KH, KW = w.shape
    p = padding
    Ho = H + 2 * p - KH + 1
    Wo = W + 2 * p - KW + 1
    Wp = W + 2 * p

    # --- fold BatchNorm (inference, running stats) into conv weight / bias ---
    scale = gamma * lax.rsqrt(running_var + eps)                       # (Cout,)
    w_f = w * scale[:, None, None, None]
    b_f = (b - running_mean) * scale + beta
    # OIHW -> (KH, KW, Cin, Cout) -> (KH*KW*Cin, Cout): matches the kernel's
    # tap-major / channel-minor im2col ordering.
    w_col = jnp.transpose(w_f, (2, 3, 1, 0)).reshape(KH * KW * Cin, Cout)
    w_col = w_col.astype(jnp.bfloat16)
    b2 = b_f.reshape(1, Cout).astype(jnp.float32)

    # --- choose the row-band tile: keep the output block lane dense ---------
    TH = None
    if row_tile:
        for cand in range(row_tile, Ho + 1):
            if Ho % cand == 0 and (cand * Wo) % 128 == 0:
                TH = cand
                break
    if TH is None:
        TH = Ho        # block == full extent on the last dim -> still legal
    nb = Ho // TH
    THp = TH + KH - 1  # band height including halo rows

    # --- prepare padded, NHWC, bf16, band-stacked input ----------------------
    # TODO(synk): fold the NCHW->NHWC transpose, zero padding and halo row
    # duplication into the kernel's input DMA path (manual halo copies) to
    # remove this extra HBM preparation pass.
    x_nhwc = jnp.transpose(x, (0, 2, 3, 1)).astype(jnp.bfloat16)
    x_pad = jnp.pad(x_nhwc, ((0, 0), (p, p), (p, p), (0, 0)))
    x_bands = jnp.stack([x_pad[:, i * TH:i * TH + THp] for i in range(nb)], axis=1)
    x_bands = x_bands.reshape(N * nb, THp, Wp, Cin)

    kernel = functools.partial(_conv_bn_lrelu_kernel, negative_slope=negative_slope)

    out = pl.pallas_call(
        kernel,
        out_shape=jax.ShapeDtypeStruct((N, Cout, Ho * Wo), jnp.float32),
        grid_spec=pltpu.PrefetchScalarGridSpec(
            num_scalar_prefetch=0,
            grid=(N, nb),
            in_specs=[
                pl.BlockSpec((1, THp, Wp, Cin),
                             lambda n, i: (n * nb + i, 0, 0, 0)),          # row band
                pl.BlockSpec((KH * KW * Cin, Cout), lambda n, i: (0, 0)),  # weights
                pl.BlockSpec((1, Cout), lambda n, i: (0, 0)),              # bias
            ],
            out_specs=pl.BlockSpec((1, Cout, TH * Wo), lambda n, i: (n, 0, i)),
            scratch_shapes=[pltpu.VMEM((TH, Wo, KH * KW * Cin), jnp.bfloat16)],
        ),
        compiler_params=pltpu.CompilerParams(
            dimension_semantics=("parallel", "parallel"),
            vmem_limit_bytes=32 * 1024 * 1024,
        ),
    )(x_bands, w_col, b2)

    # Output is already channel-major (NCHW order): free reshape, no transpose.
    return out.reshape(N, Cout, Ho, Wo)


def _reference(x, w, b, gamma, beta, mean, var, *, eps=1e-5, padding=1,
               negative_slope=0.2):
    """Pure-JAX (f32) reference matching the PyTorch ConvBlock forward (eval mode)."""
    conv = lax.conv_general_dilated(
        x, w, (1, 1), ((padding, padding), (padding, padding)),
        dimension_numbers=("NCHW", "OIHW", "NCHW"),
        precision=lax.Precision.HIGHEST)
    conv = conv + b[None, :, None, None]
    inv = gamma * lax.rsqrt(var + eps)
    y = (conv - mean[None, :, None, None]) * inv[None, :, None, None] \
        + beta[None, :, None, None]
    return jnp.maximum(y, negative_slope * y)


if __name__ == "__main__":
    # Small shapes consistent with the module (channels scaled down from 64).
    N, Cin, Cout, H, W = 2, 4, 8, 16, 16
    K = 3
    eps = 1e-5

    key = jax.random.PRNGKey(0)
    kx, kw, kb, kg, kbe, km, kv = jax.random.split(key, 7)
    x = jax.random.normal(kx, (N, Cin, H, W), dtype=jnp.float32)
    w = 0.1 * jax.random.normal(kw, (Cout, Cin, K, K), dtype=jnp.float32)
    b = 0.1 * jax.random.normal(kb, (Cout,), dtype=jnp.float32)
    gamma = 1.0 + 0.05 * jax.random.normal(kg, (Cout,), dtype=jnp.float32)
    beta = 0.1 * jax.random.normal(kbe, (Cout,), dtype=jnp.float32)
    running_mean = 0.1 * jax.random.normal(km, (Cout,), dtype=jnp.float32)
    running_var = 0.5 + jax.random.uniform(kv, (Cout,), dtype=jnp.float32)

    out = conv_block(x, w, b, gamma, beta, running_mean, running_var, eps=eps)
    out = jax.block_until_ready(out)
    assert out.shape == (N, Cout, H, W)

    # Semantics check vs. the full-f32 module forward (loose tol covers the
    # intentional bf16 cast of the MXU operands).
    ref = _reference(x, w, b, gamma, beta, running_mean, running_var, eps=eps)
    assert jnp.allclose(out, ref, atol=5e-2, rtol=5e-2)

    # Tight numerical check vs. a bf16-operand-matched reference.
    scale = gamma * lax.rsqrt(running_var + eps)
    x_q = x.astype(jnp.bfloat16).astype(jnp.float32)
    w_q = (w * scale[:, None, None, None]).astype(jnp.bfloat16).astype(jnp.float32)
    b_q = (b - running_mean) * scale + beta
    conv_q = lax.conv_general_dilated(
        x_q, w_q, (1, 1), ((1, 1), (1, 1)),
        dimension_numbers=("NCHW", "OIHW", "NCHW"),
        precision=lax.Precision.HIGHEST) + b_q[None, :, None, None]
    ref_q = jnp.maximum(conv_q, 0.2 * conv_q)
    assert jnp.allclose(out, ref_q, atol=2e-3, rtol=2e-3)

    print("KERNEL_OK")
</pallas_src>

<mosaic_0001>
module attributes {stable_mosaic.version = 11 : i64} {
  func.func @_conv_bn_lrelu_kernel(%arg0: i32, %arg1: i32, %arg2: memref<1x10x18x4xbf16, #tpu.memory_space<vmem>>, %arg3: memref<36x8xbf16, #tpu.memory_space<vmem>>, %arg4: memref<1x8xf32, #tpu.memory_space<vmem>>, %arg5: memref<1x8x128xf32, #tpu.memory_space<vmem>>, %arg6: memref<8x16x36xbf16, #tpu.memory_space<vmem>>) attributes {dimension_semantics = [#tpu.dimension_semantics<parallel>, #tpu.dimension_semantics<parallel>], iteration_bounds = array<i64: 2, 2>, scalar_prefetch = 0 : i64, scratch_operands = 1 : i64, tpu.core_type = #tpu.core_type<tc>, window_params = [{transform_indices = @transform_0, window_bounds = array<i64: 1, 10, 18, 4>}, {pipeline_mode = #tpu.pipeline_mode<synchronous>, transform_indices = @transform_1, window_bounds = array<i64: 36, 8>}, {pipeline_mode = #tpu.pipeline_mode<synchronous>, transform_indices = @transform_2, window_bounds = array<i64: 1, 8>}, {transform_indices = @transform_3, window_bounds = array<i64: 1, 8, 128>}]} {
    %c0 = arith.constant 0 : index
    %c0_0 = arith.constant 0 : index
    %c0_1 = arith.constant 0 : index
    %c0_2 = arith.constant 0 : index
    %0 = vector.load %arg2[%c0, %c0_0, %c0_1, %c0_2] : memref<1x10x18x4xbf16, #tpu.memory_space<vmem>>, vector<1x8x16x4xbf16>
    %1 = vector.shape_cast %0 : vector<1x8x16x4xbf16> to vector<8x16x4xbf16>
    %c0_3 = arith.constant 0 : index
    %c0_4 = arith.constant 0 : index
    %c0_5 = arith.constant 0 : index
    %2 = vector.load %arg6[%c0_3, %c0_4, %c0_5] : memref<8x16x36xbf16, #tpu.memory_space<vmem>>, vector<8x16x4xbf16>
    tpu.vector_store %arg6[%c0_3, %c0_4, %c0_5], %1 {strides = array<i32>} : memref<8x16x36xbf16, #tpu.memory_space<vmem>>, vector<8x16x4xbf16>,
    %c0_6 = arith.constant 0 : index
    %c0_7 = arith.constant 0 : index
    %c1 = arith.constant 1 : index
    %c0_8 = arith.constant 0 : index
    %3 = vector.load %arg2[%c0_6, %c0_7, %c1, %c0_8] : memref<1x10x18x4xbf16, #tpu.memory_space<vmem>>, vector<1x8x16x4xbf16>
    %4 = vector.shape_cast %3 : vector<1x8x16x4xbf16> to vector<8x16x4xbf16>
    %c0_9 = arith.constant 0 : index
    %c0_10 = arith.constant 0 : index
    %c4 = arith.constant 4 : index
    %5 = vector.load %arg6[%c0_9, %c0_10, %c4] : memref<8x16x36xbf16, #tpu.memory_space<vmem>>, vector<8x16x4xbf16>
    tpu.vector_store %arg6[%c0_9, %c0_10, %c4], %4 {strides = array<i32>} : memref<8x16x36xbf16, #tpu.memory_space<vmem>>, vector<8x16x4xbf16>,
    %c0_11 = arith.constant 0 : index
    %c0_12 = arith.constant 0 : index
    %c2 = arith.constant 2 : index
    %c0_13 = arith.constant 0 : index
    %6 = vector.load %arg2[%c0_11, %c0_12, %c2, %c0_13] : memref<1x10x18x4xbf16, #tpu.memory_space<vmem>>, vector<1x8x16x4xbf16>
    %7 = vector.shape_cast %6 : vector<1x8x16x4xbf16> to vector<8x16x4xbf16>
    %c0_14 = arith.constant 0 : index
    %c0_15 = arith.constant 0 : index
    %c8 = arith.constant 8 : index
    %8 = vector.load %arg6[%c0_14, %c0_15, %c8] : memref<8x16x36xbf16, #tpu.memory_space<vmem>>, vector<8x16x4xbf16>
    tpu.vector_store %arg6[%c0_14, %c0_15, %c8], %7 {strides = array<i32>} : memref<8x16x36xbf16, #tpu.memory_space<vmem>>, vector<8x16x4xbf16>,
    %c0_16 = arith.constant 0 : index
    %c1_17 = arith.constant 1 : index
    %c0_18 = arith.constant 0 : index
    %c0_19 = arith.constant 0 : index
    %9 = vector.load %arg2[%c0_16, %c1_17, %c0_18, %c0_19] : memref<1x10x18x4xbf16, #tpu.memory_space<vmem>>, vector<1x8x16x4xbf16>
    %10 = vector.shape_cast %9 : vector<1x8x16x4xbf16> to vector<8x16x4xbf16>
    %c0_20 = arith.constant 0 : index
    %c0_21 = arith.constant 0 : index
    %c12 = arith.constant 12 : index
    %11 = vector.load %arg6[%c0_20, %c0_21, %c12] : memref<8x16x36xbf16, #tpu.memory_space<vmem>>, vector<8x16x4xbf16>
    tpu.vector_store %arg6[%c0_20, %c0_21, %c12], %10 {strides = array<i32>} : memref<8x16x36xbf16, #tpu.memory_space<vmem>>, vector<8x16x4xbf16>,
    %c0_22 = arith.constant 0 : index
    %c1_23 = arith.constant 1 : index
    %c1_24 = arith.constant 1 : index
    %c0_25 = arith.constant 0 : index
    %12 = vector.load %arg2[%c0_22, %c1_23, %c1_24, %c0_25] : memref<1x10x18x4xbf16, #tpu.memory_space<vmem>>, vector<1x8x16x4xbf16>
    %13 = vector.shape_cast %12 : vector<1x8x16x4xbf16> to vector<8x16x4xbf16>
    %c0_26 = arith.constant 0 : index
    %c0_27 = arith.constant 0 : index
    %c16 = arith.constant 16 : index
    %14 = vector.load %arg6[%c0_26, %c0_27, %c16] : memref<8x16x36xbf16, #tpu.memory_space<vmem>>, vector<8x16x4xbf16>
    tpu.vector_store %arg6[%c0_26, %c0_27, %c16], %13 {strides = array<i32>} : memref<8x16x36xbf16, #tpu.memory_space<vmem>>, vector<8x16x4xbf16>,
    %c0_28 = arith.constant 0 : index
    %c1_29 = arith.constant 1 : index
    %c2_30 = arith.constant 2 : index
    %c0_31 = arith.constant 0 : index
    %15 = vector.load %arg2[%c0_28, %c1_29, %c2_30, %c0_31] : memref<1x10x18x4xbf16, #tpu.memory_space<vmem>>, vector<1x8x16x4xbf16>
    %16 = vector.shape_cast %15 : vector<1x8x16x4xbf16> to vector<8x16x4xbf16>
    %c0_32 = arith.constant 0 : index
    %c0_33 = arith.constant 0 : index
    %c20 = arith.constant 20 : index
    %17 = vector.load %arg6[%c0_32, %c0_33, %c20] : memref<8x16x36xbf16, #tpu.memory_space<vmem>>, vector<8x16x4xbf16>
    tpu.vector_store %arg6[%c0_32, %c0_33, %c20], %16 {strides = array<i32>} : memref<8x16x36xbf16, #tpu.memory_space<vmem>>, vector<8x16x4xbf16>,
    %c0_34 = arith.constant 0 : index
    %c2_35 = arith.constant 2 : index
    %c0_36 = arith.constant 0 : index
    %c0_37 = arith.constant 0 : index
    %18 = vector.load %arg2[%c0_34, %c2_35, %c0_36, %c0_37] : memref<1x10x18x4xbf16, #tpu.memory_space<vmem>>, vector<1x8x16x4xbf16>
    %19 = vector.shape_cast %18 : vector<1x8x16x4xbf16> to vector<8x16x4xbf16>
    %c0_38 = arith.constant 0 : index
    %c0_39 = arith.constant 0 : index
    %c24 = arith.constant 24 : index
    %20 = vector.load %arg6[%c0_38, %c0_39, %c24] : memref<8x16x36xbf16, #tpu.memory_space<vmem>>, vector<8x16x4xbf16>
    tpu.vector_store %arg6[%c0_38, %c0_39, %c24], %19 {strides = array<i32>} : memref<8x16x36xbf16, #tpu.memory_space<vmem>>, vector<8x16x4xbf16>,
    %c0_40 = arith.constant 0 : index
    %c2_41 = arith.constant 2 : index
    %c1_42 = arith.constant 1 : index
    %c0_43 = arith.constant 0 : index
    %21 = vector.load %arg2[%c0_40, %c2_41, %c1_42, %c0_43] : memref<1x10x18x4xbf16, #tpu.memory_space<vmem>>, vector<1x8x16x4xbf16>
    %22 = vector.shape_cast %21 : vector<1x8x16x4xbf16> to vector<8x16x4xbf16>
    %c0_44 = arith.constant 0 : index
    %c0_45 = arith.constant 0 : index
    %c28 = arith.constant 28 : index
    %23 = vector.load %arg6[%c0_44, %c0_45, %c28] : memref<8x16x36xbf16, #tpu.memory_space<vmem>>, vector<8x16x4xbf16>
    tpu.vector_store %arg6[%c0_44, %c0_45, %c28], %22 {strides = array<i32>} : memref<8x16x36xbf16, #tpu.memory_space<vmem>>, vector<8x16x4xbf16>,
    %c0_46 = arith.constant 0 : index
    %c2_47 = arith.constant 2 : index
    %c2_48 = arith.constant 2 : index
    %c0_49 = arith.constant 0 : index
    %24 = vector.load %arg2[%c0_46, %c2_47, %c2_48, %c0_49] : memref<1x10x18x4xbf16, #tpu.memory_space<vmem>>, vector<1x8x16x4xbf16>
    %25 = vector.shape_cast %24 : vector<1x8x16x4xbf16> to vector<8x16x4xbf16>
    %c0_50 = arith.constant 0 : index
    %c0_51 = arith.constant 0 : index
    %c32 = arith.constant 32 : index
    %26 = vector.load %arg6[%c0_50, %c0_51, %c32] : memref<8x16x36xbf16, #tpu.memory_space<vmem>>, vector<8x16x4xbf16>
    tpu.vector_store %arg6[%c0_50, %c0_51, %c32], %25 {strides = array<i32>} : memref<8x16x36xbf16, #tpu.memory_space<vmem>>, vector<8x16x4xbf16>,
    %c0_52 = arith.constant 0 : index
    %c0_53 = arith.constant 0 : index
    %c0_54 = arith.constant 0 : index
    %27 = vector.load %arg6[%c0_52, %c0_53, %c0_54] : memref<8x16x36xbf16, #tpu.memory_space<vmem>>, vector<8x16x36xbf16>
    %28 = vector.shape_cast %27 : vector<8x16x36xbf16> to vector<128x36xbf16>
    %c0_55 = arith.constant 0 : index
    %c0_56 = arith.constant 0 : index
    %29 = vector.load %arg3[%c0_55, %c0_56] : memref<36x8xbf16, #tpu.memory_space<vmem>>, vector<36x8xbf16>
    %cst = arith.constant dense<0.000000e+00> : vector<128x8xf32>
    %30 = tpu.matmul %28, %29, %cst {dimension_numbers = #tpu.dot_dimension_numbers<[1], [0], [0], [1], [0, 0, 1, 1], [], []>} : vector<128x36xbf16>, vector<36x8xbf16>, vector<128x8xf32> -> vector<128x8xf32>
    %c0_57 = arith.constant 0 : index
    %c0_58 = arith.constant 0 : index
    %31 = vector.load %arg4[%c0_57, %c0_58] : memref<1x8xf32, #tpu.memory_space<vmem>>, vector<1x8xf32>
    %32 = vector.broadcast %31 : vector<1x8xf32> to vector<128x8xf32>
    %33 = arith.addf %30, %32 : vector<128x8xf32>
    %cst_59 = arith.constant 2.000000e-01 : f32
    %34 = vector.broadcast %cst_59 : f32 to vector<128x8xf32>
    %35 = arith.mulf %34, %33 : vector<128x8xf32>
    %36 = arith.maximumf %33, %35 : vector<128x8xf32>
    %37 = tpu.transpose %36, [1, 0] : vector<128x8xf32> -> vector<8x128xf32>
    %c0_60 = arith.constant 0 : index
    %c0_61 = arith.constant 0 : index
    %c0_62 = arith.constant 0 : index
    %38 = vector.load %arg5[%c0_60, %c0_61, %c0_62] : memref<1x8x128xf32, #tpu.memory_space<vmem>>, vector<1x8x128xf32>
    %39 = vector.shape_cast %38 : vector<1x8x128xf32> to vector<8x128xf32>
    %40 = vector.shape_cast %37 : vector<8x128xf32> to vector<1x8x128xf32>
    tpu.vector_store %arg5[%c0_60, %c0_61, %c0_62], %40 {strides = array<i32>} : memref<1x8x128xf32, #tpu.memory_space<vmem>>, vector<1x8x128xf32>,
    return
  }
  func.func @transform_0(%arg0: i32, %arg1: i32) -> (i32, i32, i32, i32) {
    %c2_i32 = arith.constant 2 : i32
    %0 = arith.muli %arg0, %c2_i32 : i32
    %1 = arith.addi %0, %arg1 : i32
    %c0_i32 = arith.constant 0 : i32
    %c0_i32_0 = arith.constant 0 : i32
    %c0_i32_1 = arith.constant 0 : i32
    %c0_i32_2 = arith.constant 0 : i32
    return %1, %c0_i32, %c0_i32_0, %c0_i32_1 : i32, i32, i32, i32
  }
  func.func @transform_1(%arg0: i32, %arg1: i32) -> (i32, i32) {
    %c0_i32 = arith.constant 0 : i32
    %c0_i32_0 = arith.constant 0 : i32
    %c0_i32_1 = arith.constant 0 : i32
    return %c0_i32, %c0_i32_0 : i32, i32
  }
  func.func @transform_2(%arg0: i32, %arg1: i32) -> (i32, i32) {
    %c0_i32 = arith.constant 0 : i32
    %c0_i32_0 = arith.constant 0 : i32
    %c0_i32_1 = arith.constant 0 : i32
    return %c0_i32, %c0_i32_0 : i32, i32
  }
  func.func @transform_3(%arg0: i32, %arg1: i32) -> (i32, i32, i32) {
    %c0_i32 = arith.constant 0 : i32
    %c0_i32_0 = arith.constant 0 : i32
    return %arg0, %c0_i32, %arg1 : i32, i32, i32
  }
}

</mosaic_0001>

<bundles_post_ra>
// kernel: tpu_custom_call.1
= control target key start
LH: loop header
LB: loop body
LE: loop exit
PB: predicated region body
PF: predicated region fallthrough
CT: control target
= control target key end

     0   :  { %8 = vsyncpa [#allocation4], 0  ;;  %s3405_s0 = inlined_call_operand.vmem [shape: bf16[4,10,18,4], index: 0, kind: input, shape index: {}]   ;;  %s3406_s1 = inlined_call_operand.vmem [shape: bf16[36,8], index: 1, kind: input, shape index: {}]   ;;  %s3407_s2 = inlined_call_operand.vmem [shape: f32[1,8], index: 2, kind: input, shape index: {}]   ;;  %s3408_s3 = inlined_call_operand.hbm [shape: f32[2,8,256], index: 3, kind: output, shape index: {}]  }
   0x1   :  { %10 = vsyncpa [#allocation4 + $0x1], 0  ;;  %s2535_s12 = smov 0   ;;  %s2537_s13 = smov 0  }
   0x2   :  { %s2539_s14 = smov 0   ;;  %s2541_s15 = smov 0  }
   0x3   :  { %s2543_s16 = smov 0   ;;  %s2545_s17 = smov 0  }
   0x4   :  { %s2547_s18 = smov 0   ;;  %s2549_s19 = smov 0  }
   0x5 LB: > { %s2096_s20 = sadd.s32 4294967295, %s2505_s19   ;;  %s2097_s21 = sadd.s32 4294967294, %s2505_s19   ;;  %s2505_s19 = sphi %s2549_s19, %s16_s19   ;;  %s2501_s18 = sphi %s2547_s18, %s3421_s18   ;;  %s2497_s17 = sphi %s2545_s17, %s3420_s17   ;;  %s2493_s16 = sphi %s2543_s16, %s3419_s16   ;;  %s2489_s15 = sphi %s2541_s15, %s3418_s15   ;;  %s2485_s14 = sphi %s2539_s14, %s3417_s14   ;;  %s2481_s13 = sphi %s2537_s13, %s3416_s13   ;;  %s2477_s12 = sphi %s2535_s12, %s3415_s12  }
   0x6   : > { %s25_s22 = sadd.s32 1, %s2497_s17  ;;  %s28_s23 = sadd.s32 1, %s2501_s18 }
   0x7   : > { %p26_p0 = scmp.ge.s32.totalorder %s25_s22, 2  ;;  %p119_p1 = scmp.ne.s32.totalorder %s2485_s14, %s2481_s13 }
   0x8   : > { %p120_p2 = scmp.eq.s32.totalorder %s2096_s20, 3  ;;  %p125_p5 = scmp.ne.s32.totalorder %s2481_s13, %s2477_s12 }
   0x9   : > { %s3423_s22 = smov (%p26_p0, %s25_s22), 0  ;;  %s3425_s23 = smov (!%p26_p0, %s28_s23), %s2501_s18 }
   0xa   : > { %s105_s24 = ssub.s32 %s2497_s17, %s3423_s22  ;;  %p2586_p3 = por %p120_p2, %p119_p1 }
   0xb   : > { %p30_p4 = scmp.ge.s32.totalorder %s3425_s23, 2  ;;  %p126_p6 = scmp.eq.s32.totalorder %s2097_s21, 3 }
   0xc   : > { %p2102_p7 = scmp.ge.s32.totalorder %s2505_s19, 1  ;;  %p162_p9 = scmp.lt.s32.totalorder %s2505_s19, 5 }
   0xd   : > { %s3427_s23 = smov (%p30_p4, %s3425_s23), 0  ;;  %p2595_p8 = por %p126_p6, %p125_p5 }
   0xe   : > { %s104_s27 = ssub.s32 %s2501_s18, %s3427_s23  ;;  %s109_s28 = sadd.s32 1, %s2485_s14 }
   0xf   : > { %s106_s29 = sor.u32 %s105_s24, %s104_s27  ;;  %p163_p10 = pnand %p2102_p7, %p162_p9 }
  0x10   : > { %p107_p11 = scmp.eq.s32.totalorder %s106_s29, 0  ;;  %s2104_s4 = sshll.u32 (!%p163_p10), %s2493_s16, 1 }
  0x11   : > { %166 = sbr.rel (%p163_p10) target bundleno = 688 (0x2b0), region = 32  ;;  %s2608_s5 = sadd.s32 (!%p163_p10), %s2489_s15, %s2104_s4 }
  0x12   : > { %s2604_s30 = scalar_select %p107_p11, %s2485_s14, %s109_s28  }
  0x13   : > { %p190_p12 = scmp.lt.s32.totalorder (!%p163_p10), %s2608_s5, 3  ;;  %s2507_s11 = smov (!%p163_p10), 4  }
  0x14   : > { %s2508_s15 = smov (!%p163_p10), 8   ;;  %s2509_s16 = smov (!%p163_p10), 12  }
  0x15   : > { %s2510_s20 = smov (!%p163_p10), 16   ;;  %s2511_s21 = smov (!%p163_p10), 20  }
  0x16   : > { %s191_s6 = scalar_select %p190_p12, %s2608_s5, 3  ;;  %vm255_vm0 = vsmask.f32 3328  ;;  %vm256_vm1 = vsmask.f32 7440  ;;  %vm563_vm3 = vcmask 1042432  }
  0x17   : > { %vm2626_vm2 = vmor %vm255_vm0, %vm256_vm1  ;;  %vm564_vm4 = vcmask 1046532   ;;  %vm214_vm6 = vcmask 27648   ;;  %vm498_vm7 = vcmask 60448   ;;  %vm670_vm8 = vcmask 93248   ;;  %s2512_s24 = smov 28   ;;  %s2513_s27 = smov 24  }
  0x18   : > { %s2330_s7 = smul.u32 120, %s191_s6  ;;  %vm2700_vm5 = vmor %vm563_vm3, %vm564_vm4  ;;  %s2514_s28 = smov 32   ;;  %vm768_vm9 = vcmask 126048   ;;  %vm1049_vm10 = vcmask 158848   ;;  %vm1888_vm11 = vcmask 1041408   ;;  %vm1218_vm12 = vcmask 191648  }
  0x19   : > { %vm1316_vm13 = vcmask 224448   ;;  %vm1597_vm14 = vcmask 257248   ;;  %vm1766_vm15 = vcmask 290048   ;;  %vm1863_vm0 = vcmask 293888  }
  0x1a   : > { %s2615_s10 = scalar_lea.vmem %s3405_s0, %s2330_s7 }
  0x1b   : > { %v234_v0 = vld [vmem:[%s2615_s10 + $0xc] sm:$0xf]  ;;  %v235_v1 = vld [vmem:[%s2615_s10 + $0x10] sm:$0xf]  ;;  %v231_v2 = vld [vmem:[%s2615_s10] sm:$0xf] }
  0x1c   : > { %v283_v3 = vshrl.u32 %v234_v0, 16  ;;  %v286_v4 = vshll.u32 %v234_v0, 16  ;;  %v292_v5 = vshll.u32 %v235_v1, 16  ;;  %v296_v6 = vshrl.u32 %v235_v1, 16  ;;  %v232_v7 = vld [vmem:[%s2615_s10 + $0x4] sm:$0xf] }
  0x1d   : > { %v259_v8 = vshrl.u32 %v231_v2, 16  ;;  %v262_v9 = vshll.u32 %v231_v2, 16  ;;  %v268_v10 = vshll.u32 %v232_v7, 16  ;;  %v272_v11 = vshrl.u32 %v232_v7, 16  ;;  %v236_v16 = vld [vmem:[%s2615_s10 + $0x14] sm:$0x1] }
  0x1e   : > { %v285_v12 = vrot.slane %v283_v3, 4  ;;  %v288_v13 = vrot.slane %v286_v4, 5  ;;  %v294_v14 = vrot.slane %v292_v5, 5  ;;  %v298_v15 = vrot.slane %v296_v6, 4  ;;  %v241_v20 = vld [vmem:[%s2615_s10 + $0x28] sm:$0xf] }
  0x1f   : > { %v261_v17 = vrot.slane %v259_v8, 4  ;;  %v264_v18 = vrot.slane %v262_v9, 5  ;;  %v274_v19 = vrot.slane %v272_v11, 4  ;;  %v270_v22 = vrot.slane %v268_v10, 5  ;;  %v233_v24 = vld [vmem:[%s2615_s10 + $0x8] sm:$0x1] }
  0x20   : > { %v289_v21 = vor.u32 %v288_v13, %v285_v12  ;;  %v299_v23 = vor.u32 %v298_v15, %v294_v14  ;;  %v302_v27 = vshll.u32 %v236_v16, 16  ;;  %v340_v28 = vshll.u32 %v241_v20, 16  ;;  %v240_v30 = vld [vmem:[%s2615_s10 + $0x24] sm:$0xf]  ;;  %v242_v42 = vld [vmem:[%s2615_s10 + $0x2c] sm:$0x1] }
  0x21   : > { %v265_v26 = vor.u32 %v264_v18, %v261_v17  ;;  %v344_v29 = vshrl.u32 %v241_v20, 16  ;;  %v275_v33 = vor.u32 %v274_v19, %v270_v22  ;;  %v278_v34 = vshll.u32 %v233_v24, 16  ;;  %v246_v44 = vld [vmem:[%s2615_s10 + $0x3c] sm:$0xf]  ;;  %v244_v45 = vld [vmem:[%s2615_s10 + $0x34] sm:$0xf] }
  0x22   : > { %v290_v31 = vrot.slane %v289_v21, 4  ;;  %v2633_v36 = vrot.slane %v340_v28, 5  ;;  %v331_v38 = vshrl.u32 %v240_v30, 16  ;;  %v300_v40 = vrot.slane %v299_v23, 4  ;;  %v237_v50 = vld [vmem:[%s2615_s10 + $0x18] sm:$0xf] }
  0x23   : > { %v266_v32 = vrot.slane %v265_v26, 4  ;;  %v346_v37 = vrot.slane %v344_v29, 4  ;;  %v304_v41 = vrot.slane %v302_v27, 5  ;;  %v334_v43 = vshll.u32 %v240_v30, 16  ;;  %v238_v53 = vld [vmem:[%s2615_s10 + $0x1c] sm:$0xf] }
  0x24   : > { %v295_v35 = vsel %vm2626_vm2, %v290_v31, %v294_v14  ;;  %v276_v46 = vrot.slane %v275_v33, 4  ;;  %v280_v47 = vrot.slane %v278_v34, 5  ;;  %v333_v48 = vrot.slane %v331_v38, 4  ;;  %v2651_v4 = vld [vmem:[%s2615_s10 + $0x40] sm:$0xf] }
  0x25   : > { %454 = vrot.lane.b32.xlu1 %v295_v35, %s2507_s11  ;;  %v271_v39 = vsel %vm2626_vm2, %v266_v32, %v270_v22  ;;  %v336_v49 = vrot.slane %v334_v43, 5  ;;  %v347_v51 = vor.u32 %v346_v37, %v2633_v36  ;;  %v350_v52 = vshll.u32 %v242_v42, 16  ;;  %v245_v6 = vld [vmem:[%s2615_s10 + $0x38] sm:$0x1]  ;;  %v239_v12 = vld [vmem:[%s2615_s10 + $0x20] sm:$0x1] }
  0x26   : > { %450 = vrot.lane.b32.xlu0 %v271_v39, %s2507_s11  ;;  %v305_v54 = vsel %vm2626_vm2, %v300_v40, %v304_v41  ;;  %v379_v55 = vshrl.u32 %v246_v44, 16  ;;  %v382_v56 = vshll.u32 %v246_v44, 16  ;;  %v364_v57 = vshll.u32 %v244_v45, 16  ;;  %v250_v16 = vld [vmem:[%s2615_s10 + $0x4c] sm:$0xf] }
  0x27   : > { %v368_v58 = vshrl.u32 %v244_v45, 16  ;;  %v307_v59 = vshrl.u32 %v237_v50, 16  ;;  %v281_v60 = vsel %vm2626_vm2, %v276_v46, %v280_v47  ;;  %v337_v61 = vor.u32 %v336_v49, %v333_v48  ;;  %v249_v19 = vld [vmem:[%s2615_s10 + $0x48] sm:$0xf]  ;;  %v243_v29 = vld [vmem:[%s2615_s10 + $0x30] sm:$0xf] }
  0x28   : > { %v310_v62 = vshll.u32 %v237_v50, 16  ;;  %v316_v63 = vshll.u32 %v238_v53, 16  ;;  %v348_v0 = vrot.slane %v347_v51, 4  ;;  %v352_v1 = vrot.slane %v350_v52, 5  ;;  %v251_v43 = vld [vmem:[%s2615_s10 + $0x50] sm:$0x1] }
  0x29   : > { %v309_v2 = vrot.slane %v307_v59, 4  ;;  %v320_v3 = vshrl.u32 %v238_v53, 16  ;;  %v381_v5 = vrot.slane %v379_v55, 4  ;;  %v384_v8 = vrot.slane %v382_v56, 5  ;;  %v253_v48 = vld [vmem:[%s2615_s10 + $0x58] sm:$0xf] }
  0x2a   : > { %v312_v7 = vrot.slane %v310_v62, 5  ;;  %v2655_v9 = vrot.slane %v364_v57, 5  ;;  %v370_v10 = vrot.slane %v368_v58, 4  ;;  %v338_v13 = vrot.slane %v337_v61, 4  ;;  %v248_v61 = vld [vmem:[%s2615_s10 + $0x44] sm:$0x1] }
  0x2b   : > { %v322_v11 = vrot.slane %v320_v3, 4  ;;  %v318_v15 = vrot.slane %v316_v63, 5  ;;  %v353_v17 = vsel %vm2626_vm2, %v348_v0, %v352_v1  ;;  %v388_v18 = vshll.u32 %v2651_v4, 16  ;;  %v252_v1 = vld [vmem:[%s2615_s10 + $0x54] sm:$0xf] }
  0x2c   : > { %v313_v14 = vor.u32 %v312_v7, %v309_v2  ;;  %v374_v20 = vshll.u32 %v245_v6, 16  ;;  %v326_v23 = vshll.u32 %v239_v12, 16  ;;  %v385_v24 = vor.u32 %v384_v8, %v381_v5  ;;  %v254_v5 = vld [vmem:[%s2615_s10 + $0x5c] sm:$0x1] }
  0x2d   : > { %456 = vrot.lane.b32.xlu1 %v305_v54, %s2507_s11  ;;  %v323_v22 = vor.u32 %v322_v11, %v318_v15  ;;  %v371_v26 = vor.u32 %v370_v10, %v2655_v9  ;;  %v412_v27 = vshll.u32 %v250_v16, 16  ;;  %v416_v28 = vshrl.u32 %v250_v16, 16 }
  0x2e   : > { %452 = vrot.lane.b32.xlu0 %v281_v60, %s2507_s11  ;;  %v314_v21 = vrot.slane %v313_v14, 4  ;;  %v343_v30 = vsel %vm2626_vm2, %v338_v13, %v2633_v36  ;;  %v403_v32 = vshrl.u32 %v249_v19, 16  ;;  %v406_v33 = vshll.u32 %v249_v19, 16  ;;  %v515_v14 = vld [vmem:[%s2615_s10] sm:$0xe] }
  0x2f   : > { %v390_v34 = vrot.slane %v388_v18, 5  ;;  %v376_v35 = vrot.slane %v374_v20, 5  ;;  %v324_v37 = vrot.slane %v323_v22, 4  ;;  %v328_v38 = vrot.slane %v326_v23, 5 }
  0x30   : > { %v319_v31 = vsel %vm2626_vm2, %v314_v21, %v318_v15  ;;  %v355_v39 = vshrl.u32 %v243_v29, 16  ;;  %v386_v40 = vrot.slane %v385_v24, 4  ;;  %v372_v36 = vrot.slane %v371_v26, 4  ;;  %v516_v15 = vld [vmem:[%s2615_s10 + $0x4] sm:$0xf] }
  0x31   : > { %458 = vrot.lane.b32.xlu2 %v319_v31, %s2507_s11  ;;  %v414_v41 = vrot.slane %v412_v27, 5  ;;  %v418_v42 = vrot.slane %v416_v28, 4  ;;  %v405_v44 = vrot.slane %v403_v32, 4  ;;  %v408_v45 = vrot.slane %v406_v33, 5  ;;  %v519_v27 = vld [vmem:[%s2615_s10 + $0x10] sm:$0xf] }
  0x32   : > { %v357_v46 = vrot.slane %v355_v39, 4  ;;  %v358_v47 = vshll.u32 %v243_v29, 16  ;;  %v392_v49 = vshrl.u32 %v2651_v4, 16  ;;  %v329_v50 = vsel %vm2626_vm2, %v324_v37, %v328_v38  ;;  %v520_v33 = vld [vmem:[%s2615_s10 + $0x14] sm:$0x1] }
  0x33   : > { %v391_v52 = vsel %vm2626_vm2, %v386_v40, %v390_v34  ;;  %v377_v53 = vsel %vm2626_vm2, %v372_v36, %v376_v35  ;;  %v419_v54 = vor.u32 %v418_v42, %v414_v41  ;;  %v422_v55 = vshll.u32 %v251_v43, 16  ;;  %v522_v40 = vld [vmem:[%s2615_s10 + $0x1c] sm:$0xf]  ;;  %v517_v42 = vld [vmem:[%s2615_s10 + $0x8] sm:$0x1] }
  0x34   : > { %v360_v51 = vrot.slane %v358_v47, 5  ;;  %v409_v56 = vor.u32 %v408_v45, %v405_v44  ;;  %v436_v57 = vshll.u32 %v253_v48, 16  ;;  %v440_v58 = vshrl.u32 %v253_v48, 16  ;;  %v524_v44 = vld [vmem:[%s2615_s10 + $0x24] sm:$0xe] }
  0x35   : > { %464 = vrot.lane.b32.xlu1 %v353_v17, %s2507_s11  ;;  %v394_v62 = vrot.slane %v392_v49, 4  ;;  %v420_v63 = vrot.slane %v419_v54, 4  ;;  %v424_v0 = vrot.slane %v422_v55, 5  ;;  %v398_v6 = vshll.u32 %v248_v61, 16  ;;  %v525_v45 = vld [vmem:[%s2615_s10 + $0x28] sm:$0xf] }
  0x36   : > { %462 = vrot.lane.b32.xlu0 %v343_v30, %s2507_s11  ;;  %v361_v59 = vor.u32 %v360_v51, %v357_v46  ;;  %v410_v2 = vrot.slane %v409_v56, 4  ;;  %v438_v3 = vrot.slane %v436_v57, 5  ;;  %v442_v4 = vrot.slane %v440_v58, 4  ;;  %v523_v47 = vld [vmem:[%s2615_s10 + $0x20] sm:$0x1] }
  0x37   : > { %v395_v8 = vor.u32 %v394_v62, %v390_v34  ;;  %v427_v10 = vshrl.u32 %v252_v1, 16  ;;  %v430_v11 = vshll.u32 %v252_v1, 16  ;;  %v425_v12 = vsel %vm2626_vm2, %v420_v63, %v424_v0  ;;  %v518_v34 = vld [vmem:[%s2615_s10 + $0xc] sm:$0xe]  ;;  %v528_v54 = vld [vmem:[%s2615_s10 + $0x34] sm:$0xf] }
  0x38   : > { %v362_v60 = vrot.slane %v361_v59, 4  ;;  %v415_v13 = vsel %vm2626_vm2, %v410_v2, %v414_v41  ;;  %v443_v16 = vor.u32 %v442_v4, %v438_v3  ;;  %v446_v17 = vshll.u32 %v254_v5, 16  ;;  %v521_v58 = vld [vmem:[%s2615_s10 + $0x18] sm:$0xe]  ;;  %v527_v61 = vld [vmem:[%s2615_s10 + $0x30] sm:$0xe] }
  0x39   : > { %460 = vrot.lane.b32.xlu2 %v329_v50, %s2507_s11  ;;  %v400_v18 = vrot.slane %v398_v6, 5  ;;  %v429_v19 = vrot.slane %v427_v10, 4  ;;  %v432_v20 = vrot.slane %v430_v11, 5  ;;  %v2106_v21 = vrot.slane %v515_v14, 9  ;;  %v531_v2 = vld [vmem:[%s2615_s10 + $0x40] sm:$0xf] }
  0x3a   : > { %v367_v7 = vsel %vm2626_vm2, %v362_v60, %v2655_v9  ;;  %v396_v9 = vrot.slane %v395_v8, 4  ;;  %v568_v22 = vrot.slane %v516_v15, 5  ;;  %v444_v24 = vrot.slane %v443_v16, 4  ;;  %v529_v60 = vld [vmem:[%s2615_s10 + $0x38] sm:$0x1] }
  0x3b   : > { %v448_v26 = vrot.slane %v446_v17, 5  ;;  %v433_v29 = vor.u32 %v432_v20, %v429_v19  ;;  %v575_v31 = vrot.slane %v519_v27, 5  ;;  %v578_v38 = vrot.slane %v520_v33, 5  ;;  %v526_v5 = vld [vmem:[%s2615_s10 + $0x2c] sm:$0x1] }
  0x3c   : > { %v401_v28 = vsel %vm2626_vm2, %v396_v9, %v400_v18  ;;  %v569_v30 = vsel %vm2700_vm5, %v2106_v21, %v568_v22  ;;  %v2107_v39 = vrot.slane %v518_v34, 9  ;;  %v582_v46 = vrot.slane %v522_v40, 5  ;;  %v534_v8 = vld [vmem:[%s2615_s10 + $0x4c] sm:$0xf]  ;;  %v532_v11 = vld [vmem:[%s2615_s10 + $0x44] sm:$0x1] }
  0x3d   : > { %470 = vrot.lane.b32.xlu1 %v391_v52, %s2507_s11  ;;  %v449_v32 = vsel %vm2626_vm2, %v444_v24, %v448_v26  ;;  %v434_v35 = vrot.slane %v433_v29, 4  ;;  %v577_v37 = vrot.slane %v575_v31, 4  ;;  %v570_v48 = vrot.slane %v568_v22, 4  ;;  %v537_v9 = vld [vmem:[%s2615_s10 + $0x58] sm:$0xf] }
  0x3e   : > { %468 = vrot.lane.b32.xlu0 %v377_v53, %s2507_s11  ;;  %v576_v43 = vsel %vm2700_vm5, %v2107_v39, %v575_v31  ;;  %v571_v49 = vrot.slane %v517_v42, 5  ;;  %v2109_v50 = vrot.slane %v524_v44, 9  ;;  %v589_v51 = vrot.slane %v525_v45, 5  ;;  %v530_v21 = vld [vmem:[%s2615_s10 + $0x3c] sm:$0xe] }
  0x3f   : > { %v439_v36 = vsel %vm2626_vm2, %v434_v35, %v438_v3  ;;  %v579_v41 = vsel %vm2700_vm5, %v577_v37, %v578_v38  ;;  %v584_v52 = vrot.slane %v582_v46, 4  ;;  %v585_v53 = vrot.slane %v523_v47, 5  ;;  %v538_v24 = vld [vmem:[%s2615_s10 + $0x5c] sm:$0x1]  ;;  %v536_v26 = vld [vmem:[%s2615_s10 + $0x54] sm:$0xe] }
  0x40   : > { %v572_v55 = vsel %vm2700_vm5, %v570_v48, %v571_v49  ;;  %v590_v56 = vsel %vm2700_vm5, %v2109_v50, %v589_v51  ;;  %v596_v57 = vrot.slane %v528_v54, 5  ;;  %v2108_v62 = vrot.slane %v521_v58, 9  ;;  %v535_v33 = vld [vmem:[%s2615_s10 + $0x50] sm:$0x1]  ;;  %v200_v38 = vld [vmem:[%s2615_s10 + $0xc] sm:$0xf] }
  0x41   : > { %466 = vrot.lane.b32.xlu2 %v367_v7, %s2507_s11  ;;  %v586_v59 = vsel %vm2700_vm5, %v584_v52, %v585_v53  ;;  %v599_v0 = vrot.slane %v529_v60, 5  ;;  %v2110_v1 = vrot.slane %v527_v61, 9  ;;  %v533_v7 = vld [vmem:[%s2615_s10 + $0x48] sm:$0xe]  ;;  %v603_v10 = vrot.slane %v531_v2, 5 }
  0x42   : > { %v598_v63 = vrot.slane %v596_v57, 4  ;;  %v583_v3 = vsel %vm2700_vm5, %v2108_v62, %v582_v46  ;;  %v2112_v14 = vrot.slane %v533_v7, 9  ;;  %v610_v15 = vrot.slane %v534_v8, 5  ;;  %v198_v39 = vld [vmem:[%s2615_s10] sm:$0xf] }
  0x43   : > { %v597_v6 = vsel %vm2700_vm5, %v2110_v1, %v596_v57  ;;  %v605_v16 = vrot.slane %v603_v10, 4  ;;  %v606_v17 = vrot.slane %v532_v11, 5  ;;  %v617_v20 = vrot.slane %v537_v9, 5  ;;  %217 = vst.msk [vmem:[#allocation2 + $0x8] sm:$0xf] %vm214_vm6, %v200_v38 }
  0x44   : > { %v600_v4 = vsel %vm2700_vm5, %v598_v63, %v599_v0  ;;  %v611_v19 = vsel %vm2700_vm5, %v2112_v14, %v610_v15  ;;  %v2111_v27 = vrot.slane %v530_v21, 9  ;;  %v620_v29 = vrot.slane %v538_v24, 5  ;;  %215 = vst.msk [vmem:[#allocation2] sm:$0xf] %vm214_vm6, %v198_v39  ;;  %v202_v42 = vld [vmem:[%s2615_s10 + $0x18] sm:$0xf] }
  0x45   : > { %476 = vrot.lane.b32.xlu1 %v425_v12, %s2507_s11  ;;  %v591_v12 = vrot.slane %v589_v51, 4  ;;  %v607_v22 = vsel %vm2700_vm5, %v605_v16, %v606_v17  ;;  %v612_v35 = vrot.slane %v610_v15, 4  ;;  %v613_v37 = vrot.slane %v535_v33, 5  ;;  %219 = vst.msk [vmem:[#allocation2 + $0x10] sm:$0xf] %vm214_vm6, %v202_v42 }
  0x46   : > { %474 = vrot.lane.b32.xlu0 %v415_v13, %s2507_s11  ;;  %v592_v13 = vrot.slane %v526_v5, 5  ;;  %v604_v31 = vsel %vm2700_vm5, %v2111_v27, %v603_v10  ;;  %v199_v44 = vld [vmem:[%s2615_s10 + $0x4] sm:$0xf]  ;;  %v2114_v45 = vld [vmem:[%s2615_s10 + $0xc] sm:$0xf] }
  0x47   : > { %v614_v40 = vsel %vm2700_vm5, %v612_v35, %v613_v37  ;;  %216 = vst.msk [vmem:[#allocation2 + $0x4] sm:$0xf] %vm214_vm6, %v199_v44  ;;  %v2119_v46 = vld [vmem:[%s2615_s10 + $0x28] sm:$0xf]  ;;  %v2118_v47 = vld [vmem:[%s2615_s10 + $0x24] sm:$0xf] }
  0x48   : > { %v593_v18 = vsel %vm2700_vm5, %v591_v12, %v592_v13  ;;  %v203_v48 = vld [vmem:[%s2615_s10 + $0x1c] sm:$0xf]  ;;  %v205_v49 = vld [vmem:[%s2615_s10 + $0x28] sm:$0xf]  ;;  %v204_v50 = vld [vmem:[%s2615_s10 + $0x24] sm:$0xf] }
  0x49   : > { %472 = vrot.lane.b32.xlu2 %v401_v28, %s2507_s11  ;;  %v619_v28 = vrot.slane %v617_v20, 4  ;;  %220 = vst.msk [vmem:[#allocation2 + $0x14] sm:$0xf] %vm214_vm6, %v203_v48  ;;  %v2117_v51 = vld [vmem:[%s2615_s10 + $0x1c] sm:$0xf] }
  0x4a   : > { %222 = vst.msk [vmem:[#allocation2 + $0x1c] sm:$0xf] %vm214_vm6, %v205_v49  ;;  %v2122_v52 = vld [vmem:[%s2615_s10 + $0x3c] sm:$0xf]  ;;  %v2121_v53 = vld [vmem:[%s2615_s10 + $0x34] sm:$0xf] }
  0x4b   : > { %221 = vst.msk [vmem:[#allocation2 + $0x18] sm:$0xf] %vm214_vm6, %v204_v50  ;;  %v2131_v54 = vld [vmem:[%s2615_s10 + $0x10] sm:$0xf]  ;;  %v208_v58 = vld [vmem:[%s2615_s10 + $0x3c] sm:$0xf] }
  0x4c   : > { %v206_v57 = vld [vmem:[%s2615_s10 + $0x30] sm:$0xf]  ;;  %v819_v60 = vshll.u32 %v2131_v54, 16  ;;  %v823_v61 = vshrl.u32 %v2131_v54, 16  ;;  %225 = vst.msk [vmem:[#allocation2 + $0x28] sm:$0xf] %vm214_vm6, %v208_v58 }
  0x4d   : > { %622 = vrot.lane.b32.xlu1 %v569_v30, %s2508_s15  ;;  %v2113_v30 = vrot.slane %v536_v26, 9  ;;  %223 = vst.msk [vmem:[#allocation2 + $0x20] sm:$0xf] %vm214_vm6, %v206_v57  ;;  %v2120_v0 = vld [vmem:[%s2615_s10 + $0x30] sm:$0xf] }
  0x4e   : > { %480 = vrot.lane.b32.xlu0 %v449_v32, %s2507_s11  ;;  %v621_v32 = vsel %vm2700_vm5, %v619_v28, %v620_v29  ;;  %v2125_v1 = vld [vmem:[%s2615_s10 + $0x4c] sm:$0xf]  ;;  %v2124_v2 = vld [vmem:[%s2615_s10 + $0x48] sm:$0xf]  ;;  %v825_v5 = vrot.slane %v823_v61, 4 }
  0x4f   : > { %v618_v34 = vsel %vm2700_vm5, %v2113_v30, %v617_v20  ;;  %v2136_v8 = vld [vmem:[%s2615_s10 + $0x24] sm:$0xf]  ;;  %v2134_v13 = vld [vmem:[%s2615_s10 + $0x1c] sm:$0xf]  ;;  %v209_v14 = vld [vmem:[%s2615_s10 + $0x40] sm:$0xf] }
  0x50   : > { %v858_v9 = vshrl.u32 %v2136_v8, 16  ;;  %v2123_v20 = vld [vmem:[%s2615_s10 + $0x40] sm:$0xf]  ;;  %v210_v21 = vld [vmem:[%s2615_s10 + $0x48] sm:$0xf]  ;;  %v843_v24 = vshll.u32 %v2134_v13, 16 }
  0x51   : > { %478 = vrot.lane.b32.xlu2 %v439_v36, %s2507_s11  ;;  %v2116_v36 = vld [vmem:[%s2615_s10 + $0x18] sm:$0xf]  ;;  %v847_v26 = vshrl.u32 %v2134_v13, 16  ;;  %226 = vst.msk [vmem:[#allocation2 + $0x2c] sm:$0xf] %vm214_vm6, %v209_v14 }
  0x52   : > { %v2127_v27 = vld [vmem:[%s2615_s10 + $0x58] sm:$0xf]  ;;  %227 = vst.msk [vmem:[#allocation2 + $0x30] sm:$0xf] %vm214_vm6, %v210_v21  ;;  %v860_v33 = vrot.slane %v858_v9, 4  ;;  %v2857_v38 = vrot.slane %v843_v24, 5 }
  0x53   : > { %v2133_v35 = vld [vmem:[%s2615_s10 + $0x18] sm:$0xf]  ;;  %v2135_v37 = vld [vmem:[%s2615_s10 + $0x20] sm:$0x1]  ;;  %v849_v39 = vrot.slane %v847_v26, 4 }
  0x54   : > { %v212_v44 = vld [vmem:[%s2615_s10 + $0x54] sm:$0xf]  ;;  %v837_v48 = vshll.u32 %v2133_v35, 16  ;;  %v853_v57 = vshll.u32 %v2135_v37, 16 }
  0x55   : > { %628 = vrot.lane.b32.xlu1 %v579_v41, %s2508_s15  ;;  %v2115_v41 = vld [vmem:[%s2615_s10 + $0x10] sm:$0xf]  ;;  %v2126_v49 = vld [vmem:[%s2615_s10 + $0x54] sm:$0xf]  ;;  %229 = vst.msk [vmem:[#allocation2 + $0x38] sm:$0xf] %vm214_vm6, %v212_v44 }
  0x56   : > { %626 = vrot.lane.b32.xlu0 %v576_v43, %s2508_s15  ;;  %v201_v43 = vld [vmem:[%s2615_s10 + $0x10] sm:$0xf]  ;;  %v839_v61 = vrot.slane %v837_v48, 5 }
  0x57   : > { %218 = vst.msk [vmem:[#allocation2 + $0xc] sm:$0xf] %vm214_vm6, %v201_v43 }
  0x59   : > { %624 = vrot.lane.b32.xlu2 %v572_v55, %s2508_s15  ;;  %v2130_v55 = vld [vmem:[%s2615_s10 + $0xc] sm:$0xf] }
  0x5a   : > { %v810_v62 = vshrl.u32 %v2130_v55, 16  ;;  %v813_v63 = vshll.u32 %v2130_v55, 16 }
  0x5c   : > { %v815_v7 = vrot.slane %v813_v63, 5 }
  0x5d   : > { %634 = vrot.lane.b32.xlu1 %v590_v56, %s2508_s15 }
  0x5e   : > { %632 = vrot.lane.b32.xlu0 %v586_v59, %s2508_s15  ;;  %v207_v59 = vld [vmem:[%s2615_s10 + $0x34] sm:$0xf] }
  0x5f   : > { %224 = vst.msk [vmem:[#allocation2 + $0x24] sm:$0xf] %vm214_vm6, %v207_v59 }
  0x61   : > { %630 = vrot.lane.b32.xlu2 %v583_v3, %s2508_s15  ;;  %v2132_v3 = vld [vmem:[%s2615_s10 + $0x14] sm:$0x1] }
  0x62   : > { %v829_v10 = vshll.u32 %v2132_v3, 16 }
  0x64   : > { %v831_v28 = vrot.slane %v829_v10, 5 }
  0x65   : > { %640 = vrot.lane.b32.xlu1 %v600_v4, %s2508_s15  ;;  %v2829_v4 = vrot.slane %v819_v60, 5 }
  0x66   : > { %638 = vrot.lane.b32.xlu0 %v597_v6, %s2508_s15  ;;  %v812_v6 = vrot.slane %v810_v62, 4  ;;  %v2141_v62 = vld [vmem:[%s2615_s10 + $0x38] sm:$0x1] }
  0x67   : > { %v826_v16 = vor.u32 %v825_v5, %v2829_v4  ;;  %v901_v13 = vshll.u32 %v2141_v62, 16  ;;  %v2202_v62 = vld [vmem:[%s2615_s10 + $0x18] sm:$0xf] }
  0x68   : > { %v816_v17 = vor.u32 %v815_v7, %v812_v6  ;;  %v855_v7 = vrot.slane %v853_v57, 5 }
  0x69   : > { %636 = vrot.lane.b32.xlu2 %v593_v18, %s2508_s15  ;;  %v861_v18 = vshll.u32 %v2136_v8, 16  ;;  %v827_v29 = vrot.slane %v826_v16, 4  ;;  %v2143_v8 = vld [vmem:[%s2615_s10 + $0x40] sm:$0xf]  ;;  %v2129_v16 = vld [vmem:[%s2615_s10 + $0x64] sm:$0xf] }
  0x6a   : > { %v817_v30 = vrot.slane %v816_v17, 4  ;;  %v903_v24 = vrot.slane %v901_v13, 5 }
  0x6c   : > { %v822_v55 = vsel %vm2626_vm2, %v817_v30, %v2829_v4  ;;  %v2145_v4 = vld [vmem:[%s2615_s10 + $0x48] sm:$0xf] }
  0x6d   : > { %646 = vrot.lane.b32.xlu1 %v611_v19, %s2508_s15  ;;  %v211_v19 = vld [vmem:[%s2615_s10 + $0x4c] sm:$0xf]  ;;  %v930_v17 = vshrl.u32 %v2145_v4, 16  ;;  %v933_v9 = vshll.u32 %v2145_v4, 16 }
  0x6e   : > { %644 = vrot.lane.b32.xlu0 %v607_v22, %s2508_s15  ;;  %v2128_v22 = vld [vmem:[%s2615_s10 + $0x60] sm:$0xf]  ;;  %228 = vst.msk [vmem:[#allocation2 + $0x34] sm:$0xf] %vm214_vm6, %v211_v19  ;;  %v915_v19 = vshll.u32 %v2143_v8, 16 }
  0x71   : > { %642 = vrot.lane.b32.xlu2 %v604_v31, %s2508_s15  ;;  %v2140_v31 = vld [vmem:[%s2615_s10 + $0x34] sm:$0xf] }
  0x72   : > { %v891_v42 = vshll.u32 %v2140_v31, 16  ;;  %v895_v43 = vshrl.u32 %v2140_v31, 16  ;;  %v2896_v31 = vrot.slane %v915_v19, 5 }
  0x74   : > { %v2876_v58 = vrot.slane %v891_v42, 5  ;;  %v897_v59 = vrot.slane %v895_v43, 4 }
  0x75   : > { %652 = vrot.lane.b32.xlu1 %v621_v32, %s2508_s15  ;;  %v2852_v32 = vld [vmem:[%s2615_s10 + $0x28] sm:$0xf] }
  0x76   : > { %650 = vrot.lane.b32.xlu0 %v618_v34, %s2508_s15  ;;  %v863_v34 = vrot.slane %v861_v18, 5  ;;  %v867_v54 = vshll.u32 %v2852_v32, 16 }
  0x79   : > { %648 = vrot.lane.b32.xlu2 %v614_v40, %s2508_s15  ;;  %s185_s15 = sand.u32 1, %s2481_s13  }
  0x7a   : > { %s2007_s6 = scalar_lea.sflag [#allocation4], %s185_s15 }
  0x7d   : > { %724 = vrot.lane.b32.xlu1 %v2116_v36, %s2509_s16  ;;  %v2139_v36 = vld [vmem:[%s2615_s10 + $0x30] sm:$0xf] }
  0x7e   : > { %722 = vrot.lane.b32.xlu0 %v2115_v41, %s2509_s16  ;;  %v882_v50 = vshrl.u32 %v2139_v36, 16 }
  0x80   : > { %v884_v63 = vrot.slane %v882_v50, 4 }
  0x81   : > { %720 = vrot.lane.b32.xlu2 %v2114_v45, %s2509_s16 }
  0x85   : > { %730 = vrot.lane.b32.xlu1 %v2119_v46, %s2509_s16  ;;  %v213_v46 = vld [vmem:[%s2615_s10 + $0x58] sm:$0xf] }
  0x86   : > { %728 = vrot.lane.b32.xlu0 %v2118_v47, %s2509_s16  ;;  %v834_v47 = vshrl.u32 %v2133_v35, 16  ;;  %230 = vst.msk [vmem:[#allocation2 + $0x3c] sm:$0xf] %vm214_vm6, %v213_v46  ;;  %v2142_v35 = vld [vmem:[%s2615_s10 + $0x3c] sm:$0xf] }
  0x87   : > { %v909_v46 = vshll.u32 %v2142_v35, 16 }
  0x88   : > { %v836_v60 = vrot.slane %v834_v47, 4 }
  0x89   : > { %726 = vrot.lane.b32.xlu2 %v2117_v51, %s2509_s16  ;;  %v885_v51 = vshll.u32 %v2139_v36, 16 }
  0x8a   : > { %v840_v14 = vor.u32 %v839_v61, %v836_v60 }
  0x8b   : > { %v459_v56 = vpop.permute.xlu2 %458 }
  0x8c   : > { %503 = vst.msk [vmem:[#allocation2 + $0x10] sm:$0xf] %vm498_vm7, %v459_v56  ;;  %v850_v56 = vor.u32 %v849_v39, %v2857_v38  ;;  %v841_v26 = vrot.slane %v840_v14, 4  ;;  %v2146_v39 = vld [vmem:[%s2615_s10 + $0x4c] sm:$0xf] }
  0x8d   : > { %736 = vrot.lane.b32.xlu1 %v2122_v52, %s2509_s16  ;;  %v832_v52 = vsel %vm2626_vm2, %v827_v29, %v831_v28  ;;  %v932_v28 = vrot.slane %v930_v17, 4  ;;  %v935_v29 = vrot.slane %v933_v9, 5  ;;  %v939_v48 = vshll.u32 %v2146_v39, 16  ;;  %v2147_v9 = vld [vmem:[%s2615_s10 + $0x50] sm:$0x1] }
  0x8e   : > { %734 = vrot.lane.b32.xlu0 %v2121_v53, %s2509_s16  ;;  %v864_v53 = vor.u32 %v863_v34, %v860_v33  ;;  %v851_v6 = vrot.slane %v850_v56, 4  ;;  %v2138_v34 = vld [vmem:[%s2615_s10 + $0x2c] sm:$0x1]  ;;  %v846_v42 = vsel %vm2626_vm2, %v841_v26, %v2857_v38  ;;  %v949_v26 = vshll.u32 %v2147_v9, 16  ;;  %v2190_v9 = vld [vmem:[%s2615_s10 + $0x30] sm:$0xf] }
  0x8f   : > { %v877_v44 = vshll.u32 %v2138_v34, 16  ;;  %v936_v47 = vor.u32 %v935_v29, %v932_v28  ;;  %v941_v56 = vrot.slane %v939_v48, 5 }
  0x90   : > { %v856_v21 = vsel %vm2626_vm2, %v851_v6, %v855_v7  ;;  %v1361_v6 = vshll.u32 %v2202_v62, 16 }
  0x91   : > { %732 = vrot.lane.b32.xlu2 %v2120_v0, %s2509_s16  ;;  %v887_v0 = vrot.slane %v885_v51, 5 }
  0x93   : > { %v461_v11 = vpop.permute.xlu2 %460 }
  0x94   : > { %504 = vst.msk [vmem:[#allocation2 + $0x14] sm:$0xf] %vm498_vm7, %v461_v11  ;;  %v871_v11 = vshrl.u32 %v2852_v32, 16 }
  0x95   : > { %742 = vrot.lane.b32.xlu1 %v2125_v1, %s2509_s16  ;;  %v865_v1 = vrot.slane %v864_v53, 4 }
  0x96   : > { %740 = vrot.lane.b32.xlu0 %v2124_v2, %s2509_s16  ;;  %v869_v2 = vrot.slane %v867_v54, 5  ;;  %v873_v30 = vrot.slane %v871_v11, 4  ;;  %v911_v54 = vrot.slane %v909_v46, 5  ;;  %v2226_v46 = vld [vmem:[%s2615_s10 + $0x18] sm:$0xe] }
  0x97   : > { %v455_v12 = vpop.permute.xlu1 %454 }
  0x98   : > { %501 = vst.msk [vmem:[#allocation2 + $0x8] sm:$0xf] %vm498_vm7, %v455_v12  ;;  %v451_v15 = vpop.permute.xlu0 %450  ;;  %v898_v12 = vor.u32 %v897_v59, %v2876_v58  ;;  %v870_v18 = vsel %vm2626_vm2, %v865_v1, %v869_v2  ;;  %v874_v43 = vor.u32 %v873_v30, %v869_v2 }
  0x99   : > { %499 = vst.msk [vmem:[#allocation2] sm:$0xf] %vm498_vm7, %v451_v15  ;;  %738 = vrot.lane.b32.xlu2 %v2123_v20, %s2509_s16  ;;  %v888_v15 = vor.u32 %v887_v0, %v884_v63  ;;  %v919_v20 = vshrl.u32 %v2143_v8, 16  ;;  %v943_v0 = vshrl.u32 %v2146_v39, 16  ;;  %v2156_v8 = vld [vmem:[%s2615_s10 + $0x14] sm:$0x1] }
  0x9a   : > { %v875_v38 = vrot.slane %v874_v43, 4  ;;  %v1119_v14 = vrot.slane %v2156_v8, 5  ;;  %v2227_v39 = vld [vmem:[%s2615_s10 + $0x1c] sm:$0xf] }
  0x9b   : > { %v467_v40 = vpop.permute.xlu2 %466  ;;  %v921_v32 = vrot.slane %v919_v20, 4  ;;  %v2203_v20 = vld [vmem:[%s2615_s10 + $0x1c] sm:$0xf]  ;;  %v1664_v43 = vrot.slane %v2227_v39, 5 }
  0x9c   : > { %507 = vst.msk [vmem:[#allocation2 + $0x20] sm:$0xf] %vm498_vm7, %v467_v40  ;;  %v2144_v40 = vld [vmem:[%s2615_s10 + $0x44] sm:$0x1]  ;;  %v1367_v29 = vshll.u32 %v2203_v20, 16 }
  0x9d   : > { %748 = vrot.lane.b32.xlu1 %v2128_v22, %s2509_s16  ;;  %v899_v22 = vrot.slane %v898_v12, 4  ;;  %v925_v50 = vshll.u32 %v2144_v40, 16  ;;  %v945_v12 = vrot.slane %v943_v0, 4  ;;  %v1666_v48 = vrot.slane %v1664_v43, 4  ;;  %v2158_v39 = vld [vmem:[%s2615_s10 + $0x1c] sm:$0xf] }
  0x9e   : > { %746 = vrot.lane.b32.xlu0 %v2127_v27, %s2509_s16  ;;  %v889_v27 = vrot.slane %v888_v15, 4  ;;  %v1369_v34 = vrot.slane %v1367_v29, 5 }
  0x9f   : > { %v457_v41 = vpop.permute.xlu1 %456  ;;  %v927_v59 = vrot.slane %v925_v50, 5  ;;  %v2250_v50 = vrot.slane %v2226_v46, 9 }
  0xa0   : > { %502 = vst.msk [vmem:[#allocation2 + $0xc] sm:$0xf] %vm498_vm7, %v457_v41  ;;  %v453_v45 = vpop.permute.xlu0 %452  ;;  %v904_v41 = vsel %vm2626_vm2, %v899_v22, %v903_v24  ;;  %v894_v51 = vsel %vm2626_vm2, %v889_v27, %v2876_v58  ;;  %v2155_v58 = vld [vmem:[%s2615_s10 + $0x10] sm:$0xf]  ;;  %v946_v24 = vor.u32 %v945_v12, %v941_v56 }
  0xa1   : > { %500 = vst.msk [vmem:[#allocation2 + $0x4] sm:$0xf] %vm498_vm7, %v453_v45  ;;  %744 = vrot.lane.b32.xlu2 %v2126_v49, %s2509_s16  ;;  %v906_v45 = vshrl.u32 %v2142_v35, 16  ;;  %v922_v49 = vor.u32 %v921_v32, %v2896_v31  ;;  %v1116_v4 = vrot.slane %v2155_v58, 5  ;;  %v1665_v0 = vsel %vm2700_vm5, %v2250_v50, %v1664_v43 }
  0xa2   : > { %v947_v32 = vrot.slane %v946_v24, 4 }
  0xa3   : > { %v473_v3 = vpop.permute.xlu2 %472  ;;  %v908_v53 = vrot.slane %v906_v45, 4  ;;  %v923_v57 = vrot.slane %v922_v49, 4  ;;  %v1118_v13 = vrot.slane %v1116_v4, 4  ;;  %v2228_v45 = vld [vmem:[%s2615_s10 + $0x20] sm:$0x1] }
  0xa4   : > { %510 = vst.msk [vmem:[#allocation2 + $0x2c] sm:$0xf] %vm498_vm7, %v473_v3  ;;  %v1667_v49 = vrot.slane %v2228_v45, 5 }
  0xa5   : > { %1003 = vrot.lane.b32.xlu1 %v832_v52, %s2510_s20  ;;  %v879_v52 = vrot.slane %v877_v44, 5  ;;  %v912_v2 = vor.u32 %v911_v54, %v908_v53  ;;  %v928_v7 = vsel %vm2626_vm2, %v923_v57, %v927_v59  ;;  %v1120_v27 = vsel %vm2700_vm5, %v1118_v13, %v1119_v14  ;;  %v2187_v44 = vld [vmem:[%s2615_s10 + $0x1c] sm:$0xf]  ;;  %v2161_v53 = vld [vmem:[%s2615_s10 + $0x28] sm:$0xf] }
  0xa6   : > { %1001 = vrot.lane.b32.xlu0 %v822_v55, %s2510_s20  ;;  %v937_v55 = vrot.slane %v936_v47, 4  ;;  %v2209_v54 = vld [vmem:[%s2615_s10 + $0x34] sm:$0xf]  ;;  %v2186_v57 = vld [vmem:[%s2615_s10 + $0x18] sm:$0xf]  ;;  %v1130_v58 = vrot.slane %v2161_v53, 5 }
  0xa7   : > { %v465_v5 = vpop.permute.xlu1 %464  ;;  %v880_v1 = vsel %vm2626_vm2, %v875_v38, %v879_v52  ;;  %v913_v11 = vrot.slane %v912_v2, 4  ;;  %v2204_v38 = vld [vmem:[%s2615_s10 + $0x20] sm:$0x1]  ;;  %v2210_v13 = vld [vmem:[%s2615_s10 + $0x38] sm:$0x1] }
  0xa8   : > { %506 = vst.msk [vmem:[#allocation2 + $0x1c] sm:$0xf] %vm498_vm7, %v465_v5  ;;  %v463_v10 = vpop.permute.xlu0 %462  ;;  %v942_v3 = vsel %vm2626_vm2, %v937_v55, %v941_v56  ;;  %v1358_v5 = vshrl.u32 %v2202_v62, 16  ;;  %v2208_v56 = vld [vmem:[%s2615_s10 + $0x30] sm:$0xf]  ;;  %v1415_v62 = vshll.u32 %v2209_v54, 16 }
  0xa9   : > { %505 = vst.msk [vmem:[#allocation2 + $0x18] sm:$0xf] %vm498_vm7, %v463_v10  ;;  %750 = vrot.lane.b32.xlu2 %v2129_v16, %s2509_s16  ;;  %v2154_v10 = vld [vmem:[%s2615_s10 + $0xc] sm:$0xe]  ;;  %v1363_v16 = vrot.slane %v1361_v6, 5  ;;  %v918_v22 = vsel %vm2626_vm2, %v913_v11, %v2896_v31  ;;  %v1406_v2 = vshrl.u32 %v2208_v56, 16 }
  0xaa   : > { %v1360_v15 = vrot.slane %v1358_v5, 4  ;;  %v2178_v19 = vrot.slane %v2154_v10, 9  ;;  %v1132_v6 = vrot.slane %v1130_v58, 4  ;;  %v1417_v8 = vrot.slane %v1415_v62, 5  ;;  %s2103_s16 = sshll.u32 %s185_s15, 3 }
  0xab   : > { %v479_v33 = vpop.permute.xlu2 %478  ;;  %v1408_v14 = vrot.slane %v1406_v2, 4  ;;  %v2159_v2 = vld [vmem:[%s2615_s10 + $0x20] sm:$0x1] }
  0xac   : > { %513 = vst.msk [vmem:[#allocation2 + $0x38] sm:$0xf] %vm498_vm7, %v479_v33  ;;  %v1364_v28 = vor.u32 %v1363_v16, %v1360_v15  ;;  %v1117_v30 = vsel %vm2700_vm5, %v2178_v19, %v1116_v4  ;;  %v951_v33 = vrot.slane %v949_v26, 5  ;;  %v1425_v19 = vshll.u32 %v2210_v13, 16 }
  0xad   : > { %1009 = vrot.lane.b32.xlu1 %v870_v18, %s2510_s20 }
  0xae   : > { %1007 = vrot.lane.b32.xlu0 %v856_v21, %s2510_s20  ;;  %v1365_v31 = vrot.slane %v1364_v28, 4 }
  0xaf   : > { %v471_v37 = vpop.permute.xlu1 %470 }
  0xb0   : > { %509 = vst.msk [vmem:[#allocation2 + $0x28] sm:$0xf] %vm498_vm7, %v471_v37  ;;  %v469_v36 = vpop.permute.xlu0 %468 }
  0xb1   : > { %508 = vst.msk [vmem:[#allocation2 + $0x24] sm:$0xf] %vm498_vm7, %v469_v36  ;;  %1005 = vrot.lane.b32.xlu2 %v846_v42, %s2510_s20  ;;  %v1371_v36 = vshrl.u32 %v2203_v20, 16  ;;  %v1370_v42 = vsel %vm2626_vm2, %v1365_v31, %v1369_v34  ;;  %v2160_v20 = vld [vmem:[%s2615_s10 + $0x24] sm:$0xe] }
  0xb2   : > { %v2180_v24 = vrot.slane %v2160_v20, 9 }
  0xb3   : > { %v625_v60 = vpop.permute.xlu2 %624  ;;  %v1373_v47 = vrot.slane %v1371_v36, 4  ;;  %v2234_v36 = vld [vmem:[%s2615_s10 + $0x38] sm:$0x1] }
  0xb4   : > { %672 = vst.msk [vmem:[#allocation2 + $0x4] sm:$0xf] %vm670_vm8, %v625_v60  ;;  %v1377_v60 = vshll.u32 %v2204_v38, 16  ;;  %v1131_v31 = vsel %vm2700_vm5, %v2180_v24, %v1130_v58  ;;  %v1681_v46 = vrot.slane %v2234_v36, 5  ;;  %v2167_v58 = vld [vmem:[%s2615_s10 + $0x40] sm:$0xf] }
  0xb5   : > { %1015 = vrot.lane.b32.xlu1 %v904_v41, %s2510_s20  ;;  %v952_v41 = vsel %vm2626_vm2, %v947_v32, %v951_v33  ;;  %v1374_v59 = vor.u32 %v1373_v47, %v1369_v34  ;;  %v2233_v33 = vld [vmem:[%s2615_s10 + $0x34] sm:$0xf]  ;;  %v2205_v47 = vld [vmem:[%s2615_s10 + $0x24] sm:$0xf] }
  0xb6   : > { %1013 = vrot.lane.b32.xlu0 %v894_v51, %s2510_s20  ;;  %v1379_v5 = vrot.slane %v1377_v60, 5  ;;  %v1385_v38 = vshll.u32 %v2205_v47, 16  ;;  %v2206_v60 = vld [vmem:[%s2615_s10 + $0x28] sm:$0xf] }
  0xb7   : > { %v477_v61 = vpop.permute.xlu1 %476  ;;  %v1375_v4 = vrot.slane %v1374_v59, 4 }
  0xb8   : > { %512 = vst.msk [vmem:[#allocation2 + $0x34] sm:$0xf] %vm498_vm7, %v477_v61  ;;  %v475_v63 = vpop.permute.xlu0 %474  ;;  %v1668_v61 = vsel %vm2700_vm5, %v1666_v48, %v1667_v49  ;;  %v2191_v49 = vld [vmem:[%s2615_s10 + $0x34] sm:$0xf] }
  0xb9   : > { %511 = vst.msk [vmem:[#allocation2 + $0x30] sm:$0xf] %vm498_vm7, %v475_v63  ;;  %1011 = vrot.lane.b32.xlu2 %v880_v1, %s2510_s20  ;;  %v1419_v63 = vshrl.u32 %v2209_v54, 16  ;;  %v2162_v1 = vld [vmem:[%s2615_s10 + $0x2c] sm:$0x1] }
  0xbb   : > { %v631_v17 = vpop.permute.xlu2 %630  ;;  %v1421_v10 = vrot.slane %v1419_v63, 4  ;;  %v2189_v63 = vld [vmem:[%s2615_s10 + $0x28] sm:$0xf] }
  0xbc   : > { %675 = vst.msk [vmem:[#allocation2 + $0x10] sm:$0xf] %vm670_vm8, %v631_v17  ;;  %v1380_v17 = vsel %vm2626_vm2, %v1375_v4, %v1379_v5  ;;  %v1144_v4 = vrot.slane %v2167_v58, 5  ;;  %v2168_v5 = vld [vmem:[%s2615_s10 + $0x44] sm:$0x1] }
  0xbd   : > { %1021 = vrot.lane.b32.xlu1 %v942_v3, %s2510_s20  ;;  %v1409_v3 = vshll.u32 %v2208_v56, 16  ;;  %v1387_v56 = vrot.slane %v1385_v38, 5 }
  0xbe   : > { %1019 = vrot.lane.b32.xlu0 %v928_v7, %s2510_s20  ;;  %v1133_v7 = vrot.slane %v2162_v1, 5  ;;  %v1391_v1 = vshll.u32 %v2206_v60, 16  ;;  %v1146_v13 = vrot.slane %v1144_v4, 4 }
  0xbf   : > { %v623_v18 = vpop.permute.xlu1 %622  ;;  %v1411_v15 = vrot.slane %v1409_v3, 5  ;;  %v2188_v3 = vld [vmem:[%s2615_s10 + $0x24] sm:$0xf] }
  0xc0   : > { %671 = vst.msk [vmem:[#allocation2] sm:$0xf] %vm670_vm8, %v623_v18  ;;  %v481_v21 = vpop.permute.xlu0 %480  ;;  %v1422_v18 = vor.u32 %v1421_v10, %v1417_v8  ;;  %v1393_v10 = vrot.slane %v1391_v1, 5 }
  0xc1   : > { %514 = vst.msk [vmem:[#allocation2 + $0x3c] sm:$0xf] %vm498_vm7, %v481_v21  ;;  %1017 = vrot.lane.b32.xlu2 %v918_v22, %s2510_s20  ;;  %v1134_v21 = vsel %vm2700_vm5, %v1132_v6, %v1133_v7  ;;  %v1412_v22 = vor.u32 %v1411_v15, %v1408_v14  ;;  %v1126_v7 = vrot.slane %v2159_v2, 5  ;;  %v1147_v14 = vrot.slane %v2168_v5, 5  ;;  %v2214_v15 = vld [vmem:[%s2615_s10 + $0x48] sm:$0xf] }
  0xc2   : > { %v1423_v26 = vrot.slane %v1422_v18, 4  ;;  %v1457_v20 = vshll.u32 %v2214_v15, 16 }
  0xc3   : > { %v637_v35 = vpop.permute.xlu2 %636 }
  0xc4   : > { %678 = vst.msk [vmem:[#allocation2 + $0x1c] sm:$0xf] %vm670_vm8, %v637_v35 }
  0xc5   : > { %1172 = vrot.lane.b32.xlu1 %v1120_v27, %s2511_s21  ;;  %v1427_v27 = vrot.slane %v1425_v19, 5  ;;  %v1454_v19 = vshrl.u32 %v2214_v15, 16 }
  0xc6   : > { %1170 = vrot.lane.b32.xlu0 %v1117_v30, %s2511_s21  ;;  %v1413_v30 = vrot.slane %v1412_v22, 4  ;;  %v1148_v22 = vsel %vm2700_vm5, %v1146_v13, %v1147_v14  ;;  %v2164_v14 = vld [vmem:[%s2615_s10 + $0x34] sm:$0xf] }
  0xc7   : > { %v629_v37 = vpop.permute.xlu1 %628  ;;  %v1428_v34 = vsel %vm2626_vm2, %v1423_v26, %v1427_v27  ;;  %v1456_v27 = vrot.slane %v1454_v19, 4 }
  0xc8   : > { %674 = vst.msk [vmem:[#allocation2 + $0xc] sm:$0xf] %vm670_vm8, %v629_v37  ;;  %v627_v40 = vpop.permute.xlu0 %626  ;;  %v1418_v35 = vsel %vm2626_vm2, %v1413_v30, %v1417_v8  ;;  %v2157_v37 = vld [vmem:[%s2615_s10 + $0x18] sm:$0xe]  ;;  %v2207_v30 = vld [vmem:[%s2615_s10 + $0x2c] sm:$0x1] }
  0xc9   : > { %673 = vst.msk [vmem:[#allocation2 + $0x8] sm:$0xf] %vm670_vm8, %v627_v40  ;;  %1023 = vrot.lane.b32.xlu2 %v952_v41, %s2510_s20  ;;  %v1678_v40 = vrot.slane %v2233_v33, 5  ;;  %v2179_v41 = vrot.slane %v2157_v37, 9  ;;  %v2215_v33 = vld [vmem:[%s2615_s10 + $0x4c] sm:$0xf] }
  0xcb   : > { %v643_v51 = vpop.permute.xlu2 %642  ;;  %v1680_v45 = vrot.slane %v1678_v40, 4 }
  0xcc   : > { %681 = vst.msk [vmem:[#allocation2 + $0x28] sm:$0xf] %vm670_vm8, %v643_v51  ;;  %v1382_v51 = vshrl.u32 %v2205_v47, 16 }
  0xcd   : > { %1549 = vrot.lane.b32.xlu1 %v1370_v42, %s2512_s24  ;;  %v1123_v42 = vrot.slane %v2158_v39, 5  ;;  %v1682_v53 = vsel %vm2700_vm5, %v1680_v45, %v1681_v46  ;;  %v1401_v39 = vshll.u32 %v2207_v30, 16 }
  0xce   : > { %1270 = vrot.lane.b32.xlu0 %v2187_v44, %s2513_s27 }
  0xcf   : > { %v635_v52 = vpop.permute.xlu1 %634  ;;  %v1124_v50 = vsel %vm2700_vm5, %v2179_v41, %v1123_v42  ;;  %v1125_v6 = vrot.slane %v1123_v42, 4  ;;  %v1463_v41 = vshll.u32 %v2215_v33, 16  ;;  %v1403_v46 = vrot.slane %v1401_v39, 5 }
  0xd0   : > { %677 = vst.msk [vmem:[#allocation2 + $0x18] sm:$0xf] %vm670_vm8, %v635_v52  ;;  %v633_v55 = vpop.permute.xlu0 %632  ;;  %v2232_v52 = vld [vmem:[%s2615_s10 + $0x30] sm:$0xe] }
  0xd1   : > { %676 = vst.msk [vmem:[#allocation2 + $0x14] sm:$0xf] %vm670_vm8, %v633_v55  ;;  %1268 = vrot.lane.b32.xlu2 %v2186_v57, %s2513_s27  ;;  %v2252_v54 = vrot.slane %v2232_v52, 9  ;;  %v1384_v55 = vrot.slane %v1382_v51, 4  ;;  %v2239_v52 = vld [vmem:[%s2615_s10 + $0x4c] sm:$0xf] }
  0xd3   : > { %v649_v11 = vpop.permute.xlu2 %648  ;;  %v1679_v62 = vsel %vm2700_vm5, %v2252_v54, %v1678_v40  ;;  %v2195_v40 = vld [vmem:[%s2615_s10 + $0x4c] sm:$0xf] }
  0xd4   : > { %684 = vst.msk [vmem:[#allocation2 + $0x34] sm:$0xf] %vm670_vm8, %v649_v11 }
  0xd5   : > { %1720 = vrot.lane.b32.xlu1 %v1668_v61, %s2514_s28 }
  0xd6   : > { %1718 = vrot.lane.b32.xlu0 %v1665_v0, %s2514_s28  ;;  %v1388_v0 = vor.u32 %v1387_v56, %v1384_v55  ;;  %v1467_v55 = vshrl.u32 %v2215_v33, 16  ;;  %v2240_v56 = vld [vmem:[%s2615_s10 + $0x50] sm:$0x1] }
  0xd7   : > { %v641_v12 = vpop.permute.xlu1 %640  ;;  %v1695_v1 = vrot.slane %v2240_v56, 5 }
  0xd8   : > { %680 = vst.msk [vmem:[#allocation2 + $0x24] sm:$0xf] %vm670_vm8, %v641_v12  ;;  %v639_v16 = vpop.permute.xlu0 %638  ;;  %v1389_v8 = vrot.slane %v1388_v0, 4  ;;  %v2238_v0 = vld [vmem:[%s2615_s10 + $0x48] sm:$0xe] }
  0xd9   : > { %679 = vst.msk [vmem:[#allocation2 + $0x20] sm:$0xf] %vm670_vm8, %v639_v16  ;;  %1551 = vrot.lane.b32.xlu2 %v1380_v17, %s2512_s24  ;;  %v1395_v17 = vshrl.u32 %v2206_v60, 16  ;;  %v1692_v60 = vrot.slane %v2239_v52, 5 }
  0xda   : > { %v1394_v18 = vsel %vm2626_vm2, %v1389_v8, %v1393_v10  ;;  %v2216_v8 = vld [vmem:[%s2615_s10 + $0x50] sm:$0x1] }
  0xdb   : > { %v721_v28 = vpop.permute.xlu2 %720  ;;  %v1397_v26 = vrot.slane %v1395_v17, 4  ;;  %v1473_v17 = vshll.u32 %v2216_v8, 16  ;;  %v2220_v8 = vld [vmem:[%s2615_s10 + $0x60] sm:$0xf] }
  0xdc   : > { %769 = vst.msk [vmem:[#allocation2] sm:$0xf] %vm768_vm9, %v721_v28  ;;  %v1459_v28 = vrot.slane %v1457_v20, 5 }
  0xdd   : > { %1276 = vrot.lane.b32.xlu1 %v2190_v9, %s2513_s27  ;;  %v1127_v9 = vsel %vm2700_vm5, %v1125_v6, %v1126_v7  ;;  %v1398_v37 = vor.u32 %v1397_v26, %v1393_v10  ;;  %v1475_v26 = vrot.slane %v1473_v17, 5  ;;  %v1505_v17 = vshll.u32 %v2220_v8, 16 }
  0xde   : > { %1180 = vrot.lane.b32.xlu0 %v1134_v21, %s2511_s21  ;;  %v2166_v21 = vld [vmem:[%s2615_s10 + $0x3c] sm:$0xe]  ;;  %v1460_v36 = vor.u32 %v1459_v28, %v1456_v27 }
  0xdf   : > { %v647_v29 = vpop.permute.xlu1 %646  ;;  %v2182_v24 = vrot.slane %v2166_v21, 9  ;;  %v1399_v45 = vrot.slane %v1398_v37, 4  ;;  %v1137_v21 = vrot.slane %v2164_v14, 5  ;;  %v2320_v14 = vld [vmem:[%s3406_s1 + $0x8] sm:$0xff] }
  0xe0   : > { %683 = vst.msk [vmem:[#allocation2 + $0x30] sm:$0xf] %vm670_vm8, %v647_v29  ;;  %v645_v32 = vpop.permute.xlu0 %644  ;;  %v1461_v47 = vrot.slane %v1460_v36, 4 }
  0xe1   : > { %682 = vst.msk [vmem:[#allocation2 + $0x2c] sm:$0xf] %vm670_vm8, %v645_v32  ;;  %1178 = vrot.lane.b32.xlu2 %v1131_v31, %s2511_s21  ;;  %v3051_v31 = vld [vmem:[%s2615_s10 + $0x28] sm:$0xf] }
  0xe2   : > { %v1671_v42 = vrot.slane %v3051_v31, 5  ;;  %v2211_v31 = vld [vmem:[%s2615_s10 + $0x3c] sm:$0xf] }
  0xe3   : > { %v727_v43 = vpop.permute.xlu2 %726  ;;  %v1433_v36 = vshll.u32 %v2211_v31, 16 }
  0xe4   : > { %772 = vst.msk [vmem:[#allocation2 + $0xc] sm:$0xf] %vm768_vm9, %v727_v43  ;;  %v2194_v43 = vld [vmem:[%s2615_s10 + $0x48] sm:$0xf] }
  0xe5   : > { %1559 = vrot.lane.b32.xlu1 %v1428_v34, %s2512_s24 }
  0xe6   : > { %1557 = vrot.lane.b32.xlu0 %v1418_v35, %s2512_s24  ;;  %v1145_v35 = vsel %vm2700_vm5, %v2182_v24, %v1144_v4  ;;  %v1694_v4 = vrot.slane %v1692_v60, 4 }
  0xe7   : > { %v653_v44 = vpop.permute.xlu1 %652 }
  0xe8   : > { %686 = vst.msk [vmem:[#allocation2 + $0x3c] sm:$0xf] %vm670_vm8, %v653_v44  ;;  %v651_v48 = vpop.permute.xlu0 %650  ;;  %v2231_v44 = vld [vmem:[%s2615_s10 + $0x2c] sm:$0x1] }
  0xe9   : > { %685 = vst.msk [vmem:[#allocation2 + $0x38] sm:$0xf] %vm670_vm8, %v651_v48  ;;  %1278 = vrot.lane.b32.xlu2 %v2191_v49, %s2513_s27  ;;  %v1465_v48 = vrot.slane %v1463_v41, 5  ;;  %v1673_v49 = vrot.slane %v1671_v42, 4  ;;  %v2163_v41 = vld [vmem:[%s2615_s10 + $0x30] sm:$0xe] }
  0xeb   : > { %v733_v57 = vpop.permute.xlu2 %732 }
  0xec   : > { %775 = vst.msk [vmem:[#allocation2 + $0x18] sm:$0xf] %vm768_vm9, %v733_v57  ;;  %v1404_v57 = vsel %vm2626_vm2, %v1399_v45, %v1403_v46  ;;  %v1435_v46 = vrot.slane %v1433_v36, 5 }
  0xed   : > { %1174 = vrot.lane.b32.xlu1 %v1124_v50, %s2511_s21  ;;  %v1674_v50 = vrot.slane %v2231_v44, 5 }
  0xee   : > { %1728 = vrot.lane.b32.xlu0 %v1682_v53, %s2514_s28  ;;  %v2148_v53 = vld [vmem:[%s2615_s10 + $0x54] sm:$0xf] }
  0xef   : > { %v725_v59 = vpop.permute.xlu1 %724  ;;  %v957_v58 = vshll.u32 %v2148_v53, 16 }
  0xf0   : > { %771 = vst.msk [vmem:[#allocation2 + $0x8] sm:$0xf] %vm768_vm9, %v725_v59  ;;  %v723_v61 = vpop.permute.xlu0 %722  ;;  %v1466_v59 = vsel %vm2626_vm2, %v1461_v47, %v1465_v48 }
  0xf1   : > { %770 = vst.msk [vmem:[#allocation2 + $0x4] sm:$0xf] %vm768_vm9, %v723_v61  ;;  %1726 = vrot.lane.b32.xlu2 %v1679_v62, %s2514_s28  ;;  %v954_v61 = vshrl.u32 %v2148_v53, 16  ;;  %v2229_v62 = vld [vmem:[%s2615_s10 + $0x24] sm:$0xe]  ;;  %v959_v6 = vrot.slane %v957_v58, 5 }
  0xf2   : > { %v2251_v2 = vrot.slane %v2229_v62, 9  ;;  %v2174_v58 = vld [vmem:[%s2615_s10 + $0x5c] sm:$0x1] }
  0xf3   : > { %v739_v11 = vpop.permute.xlu2 %738  ;;  %v956_v5 = vrot.slane %v954_v61, 4  ;;  %v1803_v61 = vld [vmem:[%s3406_s1 + $0x10] sm:$0x3] }
  0xf4   : > { %778 = vst.msk [vmem:[#allocation2 + $0x24] sm:$0xf] %vm768_vm9, %v739_v11  ;;  %v2254_v11 = vrot.slane %v2238_v0, 9  ;;  %v1672_v15 = vsel %vm2700_vm5, %v2251_v2, %v1671_v42  ;;  %v1857_v62 = vunpack.c.l.b16 %v1803_v61 }
  0xf5   : > { %1274 = vrot.lane.b32.xlu1 %v2189_v63, %s2513_s27  ;;  %v1675_v63 = vsel %vm2700_vm5, %v1673_v49, %v1674_v50  ;;  %v2212_v50 = vld [vmem:[%s2615_s10 + $0x40] sm:$0xf] }
  0xf6   : > { %1272 = vrot.lane.b32.xlu0 %v2188_v3, %s2513_s27  ;;  %v1469_v3 = vrot.slane %v1467_v55, 4  ;;  %v1693_v20 = vsel %vm2700_vm5, %v2254_v11, %v1692_v60  ;;  %v2193_v55 = vld [vmem:[%s2615_s10 + $0x40] sm:$0xf] }
  0xf7   : > { %v731_v12 = vpop.permute.xlu1 %730 }
  0xf8   : > { %774 = vst.msk [vmem:[#allocation2 + $0x14] sm:$0xf] %vm768_vm9, %v731_v12  ;;  %v729_v16 = vpop.permute.xlu0 %728  ;;  %v2149_v12 = vld [vmem:[%s2615_s10 + $0x58] sm:$0xf] }
  0xf9   : > { %773 = vst.msk [vmem:[#allocation2 + $0x10] sm:$0xf] %vm768_vm9, %v729_v16  ;;  %1176 = vrot.lane.b32.xlu2 %v1127_v9, %s2511_s21  ;;  %v1470_v16 = vor.u32 %v1469_v3, %v1465_v48  ;;  %v1696_v9 = vsel %vm2700_vm5, %v1694_v4, %v1695_v1  ;;  %v963_v19 = vshll.u32 %v2149_v12, 16  ;;  %v2150_v48 = vld [vmem:[%s2615_s10 + $0x5c] sm:$0x1]  ;;  %v1860_v4 = vpack.c.b16 %v1857_v62, %v1857_v62 }
  0xfb   : > { %v745_v29 = vpop.permute.xlu2 %744  ;;  %v1471_v24 = vrot.slane %v1470_v16, 4  ;;  %v965_v28 = vrot.slane %v963_v19, 5  ;;  %v1890_v11 = vsel %vm1888_vm11, %v1860_v4, 0  ;;  %v1502_v16 = vshrl.u32 %v2220_v8, 16  ;;  %v2218_v4 = vld [vmem:[%s2615_s10 + $0x58] sm:$0xf] }
  0xfc   : > { %781 = vst.msk [vmem:[#allocation2 + $0x30] sm:$0xf] %vm768_vm9, %v745_v29  ;;  %1897 = vmatpush.bf16.msra.mxu0 %v1890_v11  ;;  %2321 = vmatpush.bf16.msra.mxu1 %v1890_v11 }
  0xfd   : > { %1553 = vrot.lane.b32.xlu1 %v1394_v18, %s2512_s24  ;;  %v960_v18 = vor.u32 %v959_v6, %v956_v5  ;;  %v1476_v37 = vsel %vm2626_vm2, %v1471_v24, %v1475_v26  ;;  %2322 = vmatpush.bf16.msra.mxu2 %v1890_v11  ;;  %v1507_v24 = vrot.slane %v1505_v17, 5 }
  0xfe   : > { %1188 = vrot.lane.b32.xlu0 %v1148_v22, %s2511_s21  ;;  %v2165_v22 = vld [vmem:[%s2615_s10 + $0x38] sm:$0x1]  ;;  %2323 = vmatpush.bf16.msra.mxu3 %v1890_v11 }
  0xff   : > { %v737_v32 = vpop.permute.xlu1 %736  ;;  %v961_v27 = vrot.slane %v960_v18, 4  ;;  %v1140_v33 = vrot.slane %v2165_v22, 5  ;;  %v1504_v22 = vrot.slane %v1502_v16, 4  ;;  %v2171_v16 = vld [vmem:[%s2615_s10 + $0x50] sm:$0x1] }
 0x100   : > { %777 = vst.msk [vmem:[#allocation2 + $0x20] sm:$0xf] %vm768_vm9, %v737_v32  ;;  %v735_v34 = vpop.permute.xlu0 %734  ;;  %v1139_v32 = vrot.slane %v1137_v21, 4  ;;  %1898 = vmatpush.bf16.msra.mxu0 %v2320_v14  ;;  %2324 = vmatpush.bf16.msra.mxu1 %v2320_v14 }
 0x101   : > { %776 = vst.msk [vmem:[#allocation2 + $0x1c] sm:$0xf] %vm768_vm9, %v735_v34  ;;  %1186 = vrot.lane.b32.xlu2 %v1145_v35, %s2511_s21  ;;  %v967_v35 = vshrl.u32 %v2149_v12, 16  ;;  %v966_v39 = vsel %vm2626_vm2, %v961_v27, %v965_v28  ;;  %v1443_v12 = vshrl.u32 %v2212_v50, 16  ;;  %v2213_v27 = vld [vmem:[%s2615_s10 + $0x44] sm:$0x1]  ;;  %2325 = vmatpush.bf16.msra.mxu2 %v2320_v14 }
 0x102   : > { %v1141_v42 = vsel %vm2700_vm5, %v1139_v32, %v1140_v33  ;;  %2326 = vmatpush.bf16.msra.mxu3 %v2320_v14  ;;  %v2236_v32 = vld [vmem:[%s2615_s10 + $0x40] sm:$0xf]  ;;  %v1491_v14 = vshrl.u32 %v2218_v4, 16 }
 0x103   : > { %v751_v51 = vpop.permute.xlu2 %750  ;;  %v969_v44 = vrot.slane %v967_v35, 4  ;;  %v2199_v35 = vld [vmem:[%s2615_s10 + $0x64] sm:$0xf]  ;;  %v1685_v36 = vrot.slane %v2236_v32, 5  ;;  %v2151_v32 = vld [vmem:[%s2615_s10 + $0x60] sm:$0xf] }
 0x104   : > { %784 = vst.msk [vmem:[#allocation2 + $0x3c] sm:$0xf] %vm768_vm9, %v751_v51 }
 0x105   : > { %1286 = vrot.lane.b32.xlu1 %v2195_v40, %s2513_s27  ;;  %v1430_v40 = vshrl.u32 %v2211_v31, 16  ;;  %v970_v53 = vor.u32 %v969_v44, %v965_v28 }
 0x106   : > { %1284 = vrot.lane.b32.xlu0 %v2194_v43, %s2513_s27  ;;  %v2181_v43 = vrot.slane %v2163_v41, 9  ;;  %v2237_v41 = vld [vmem:[%s2615_s10 + $0x44] sm:$0x1] }
 0x107   : > { %v743_v38 = vpop.permute.xlu1 %742  ;;  %v1432_v45 = vrot.slane %v1430_v40, 4  ;;  %v2198_v40 = vld [vmem:[%s2615_s10 + $0x60] sm:$0xf] }
 0x108   : > { %780 = vst.msk [vmem:[#allocation2 + $0x2c] sm:$0xf] %vm768_vm9, %v743_v38  ;;  %v741_v54 = vpop.permute.xlu0 %740  ;;  %v3117_v38 = vld [vmem:[%s2615_s10 + $0x58] sm:$0xf]  ;;  %v1138_v52 = vsel %vm2700_vm5, %v2181_v43, %v1137_v21  ;;  %v2319_v21 = vld [vmem:[%s3406_s1] sm:$0xff] }
 0x109   : > { %779 = vst.msk [vmem:[#allocation2 + $0x28] sm:$0xf] %vm768_vm9, %v741_v54  ;;  %1555 = vrot.lane.b32.xlu2 %v1404_v57, %s2512_s24  ;;  %v973_v54 = vshll.u32 %v2150_v48, 16  ;;  %v1436_v56 = vor.u32 %v1435_v46, %v1432_v45  ;;  %v1439_v57 = vshll.u32 %v2212_v50, 16  ;;  %v1158_v60 = vrot.slane %v3117_v38, 5  ;;  %1899 = vmatpush.bf16.msra.mxu0 %v2319_v21 }
 0x10a   : > { %2327 = vmatpush.bf16.msra.mxu1 %v2319_v21  ;;  %2328 = vmatpush.bf16.msra.mxu2 %v2319_v21  ;;  %v1687_v48 = vrot.slane %v1685_v36, 4  ;;  %v2245_v50 = vld [vmem:[%s2615_s10 + $0x64] sm:$0xf] }
 0x10b   : > { %v1006_v7 = vpop.permute.xlu2 %1005  ;;  %v975_v0 = vrot.slane %v973_v54, 5  ;;  %v1437_v1 = vrot.slane %v1436_v56, 4  ;;  %v1441_v2 = vrot.slane %v1439_v57, 5  ;;  %v1160_v6 = vrot.slane %v1158_v60, 4  ;;  %2329 = vmatpush.bf16.msra.mxu3 %v2319_v21  ;;  %v2246_v57 = vld [vmem:[%s2615_s10 + $0x68] sm:$0x1] }
 0x10c   : > { %1052 = vst.msk [vmem:[#allocation2 + $0x8] sm:$0xf] %vm1049_vm10, %v1006_v7  ;;  %v1161_v7 = vrot.slane %v2174_v58, 5  ;;  %v1706_v54 = vrot.slane %v2245_v50, 5  ;;  %v1709_v62 = vrot.slane %v2246_v57, 5  ;;  %v1154_v21 = vrot.slane %v2171_v16, 5 }
 0x10d   : > { %1565 = vrot.lane.b32.xlu1 %v1466_v59, %s2512_s24  ;;  %v2192_v59 = vld [vmem:[%s2615_s10 + $0x3c] sm:$0xf]  ;;  %v2175_v16 = vld [vmem:[%s2615_s10 + $0x60] sm:$0xe] }
 0x10e   : > { %1724 = vrot.lane.b32.xlu0 %v1675_v63, %s2514_s28  ;;  %v971_v63 = vrot.slane %v970_v53, 4  ;;  %v1162_v18 = vsel %vm2700_vm5, %v1160_v6, %v1161_v7  ;;  %v1708_v58 = vrot.slane %v1706_v54, 4  ;;  %v2217_v6 = vld [vmem:[%s2615_s10 + $0x54] sm:$0xf] }
 0x10f   : > { %v749_v10 = vpop.permute.xlu1 %748  ;;  %v1478_v17 = vshrl.u32 %v2217_v6, 16 }
 0x110   : > { %783 = vst.msk [vmem:[#allocation2 + $0x38] sm:$0xf] %vm768_vm9, %v749_v10  ;;  %v747_v13 = vpop.permute.xlu0 %746  ;;  %v1710_v11 = vsel %vm2700_vm5, %v1708_v58, %v1709_v62 }
 0x111   : > { %782 = vst.msk [vmem:[#allocation2 + $0x34] sm:$0xf] %vm768_vm9, %v747_v13  ;;  %1722 = vrot.lane.b32.xlu2 %v1672_v15, %s2514_s28  ;;  %v976_v13 = vsel %vm2626_vm2, %v971_v63, %v975_v0  ;;  %v1442_v15 = vsel %vm2626_vm2, %v1437_v1, %v1441_v2  ;;  %v2222_v1 = vld [vmem:[%s2615_s10 + $0x68] sm:$0x1] }
 0x113   : > { %v1012_v29 = vpop.permute.xlu2 %1011 }
 0x114   : > { %1055 = vst.msk [vmem:[#allocation2 + $0x14] sm:$0xf] %vm1049_vm10, %v1012_v29  ;;  %v2221_v29 = vld [vmem:[%s2615_s10 + $0x64] sm:$0xf] }
 0x115   : > { %1736 = vrot.lane.b32.xlu1 %v1696_v9, %s2514_s28  ;;  %v2172_v9 = vld [vmem:[%s2615_s10 + $0x54] sm:$0xe]  ;;  %v1515_v38 = vshrl.u32 %v2221_v29, 16 }
 0x116   : > { %1734 = vrot.lane.b32.xlu0 %v1693_v20, %s2514_s28  ;;  %v2184_v19 = vrot.slane %v2172_v9, 9  ;;  %v1445_v20 = vrot.slane %v1443_v12, 4  ;;  %v1481_v9 = vshll.u32 %v2217_v6, 16 }
 0x117   : > { %v1004_v30 = vpop.permute.xlu1 %1003  ;;  %v1517_v61 = vrot.slane %v1515_v38, 4 }
 0x118   : > { %1051 = vst.msk [vmem:[#allocation2 + $0x4] sm:$0xf] %vm1049_vm10, %v1004_v30  ;;  %v1002_v34 = vpop.permute.xlu0 %1001  ;;  %v1159_v33 = vsel %vm2700_vm5, %v2184_v19, %v1158_v60  ;;  %v1446_v31 = vor.u32 %v1445_v20, %v1441_v2 }
 0x119   : > { %1050 = vst.msk [vmem:[#allocation2] sm:$0xf] %vm1049_vm10, %v1002_v34  ;;  %1567 = vrot.lane.b32.xlu2 %v1476_v37, %s2512_s24  ;;  %v1449_v34 = vshll.u32 %v2213_v27, 16  ;;  %v1508_v37 = vor.u32 %v1507_v24, %v1504_v22  ;;  %v1493_v24 = vrot.slane %v1491_v14, 4 }
 0x11b   : > { %v1018_v47 = vpop.permute.xlu2 %1017  ;;  %v1451_v43 = vrot.slane %v1449_v34, 5  ;;  %v1509_v44 = vrot.slane %v1508_v37, 4 }
 0x11c   : > { %1058 = vst.msk [vmem:[#allocation2 + $0x20] sm:$0xf] %vm1049_vm10, %v1018_v47 }
 0x11d   : > { %1025 = vrot.lane.b32.xlu1 %v966_v39, %s2510_s20  ;;  %v1511_v39 = vshll.u32 %v2221_v29, 16  ;;  %v1480_v29 = vrot.slane %v1478_v17, 4 }
 0x11e   : > { %1184 = vrot.lane.b32.xlu0 %v1141_v42, %s2511_s21  ;;  %v1447_v42 = vrot.slane %v1446_v31, 4  ;;  %v2196_v31 = vld [vmem:[%s2615_s10 + $0x54] sm:$0xf] }
 0x11f   : > { %v1010_v49 = vpop.permute.xlu1 %1009  ;;  %v1513_v45 = vrot.slane %v1511_v39, 5  ;;  %v978_v39 = vshrl.u32 %v2151_v32, 16 }
 0x120   : > { %1054 = vst.msk [vmem:[#allocation2 + $0x10] sm:$0xf] %vm1049_vm10, %v1010_v49  ;;  %v1008_v51 = vpop.permute.xlu0 %1007  ;;  %v1688_v49 = vrot.slane %v2237_v41, 5 }
 0x121   : > { %1053 = vst.msk [vmem:[#allocation2 + $0xc] sm:$0xf] %vm1049_vm10, %v1008_v51  ;;  %1182 = vrot.lane.b32.xlu2 %v1138_v52, %s2511_s21  ;;  %v1452_v52 = vsel %vm2626_vm2, %v1447_v42, %v1451_v43  ;;  %v1514_v53 = vsel %vm2626_vm2, %v1509_v44, %v1513_v45  ;;  %v1518_v8 = vor.u32 %v1517_v61, %v1513_v45  ;;  %v2243_v61 = vld [vmem:[%s2615_s10 + $0x5c] sm:$0x1] }
 0x122   : > { %v1689_v56 = vsel %vm2700_vm5, %v1687_v48, %v1688_v49 }
 0x123   : > { %v1024_v3 = vpop.permute.xlu2 %1023 }
 0x124   : > { %1061 = vst.msk [vmem:[#allocation2 + $0x2c] sm:$0xf] %vm1049_vm10, %v1024_v3  ;;  %v3183_v3 = vld [vmem:[%s2615_s10 + $0x4c] sm:$0xf] }
 0x125   : > { %1282 = vrot.lane.b32.xlu1 %v2193_v55, %s2513_s27  ;;  %v2235_v55 = vld [vmem:[%s2615_s10 + $0x3c] sm:$0xe]  ;;  %v1151_v12 = vrot.slane %v3183_v3, 5  ;;  %v1702_v3 = vrot.slane %v2243_v61, 5 }
 0x126   : > { %1280 = vrot.lane.b32.xlu0 %v2192_v59, %s2513_s27  ;;  %v2244_v59 = vld [vmem:[%s2615_s10 + $0x60] sm:$0xe]  ;;  %v2253_v60 = vrot.slane %v2235_v55, 9 }
 0x127   : > { %v1016_v5 = vpop.permute.xlu1 %1015  ;;  %v2256_v63 = vrot.slane %v2244_v59, 9  ;;  %v1153_v20 = vrot.slane %v1151_v12, 4 }
 0x128   : > { %1057 = vst.msk [vmem:[#allocation2 + $0x1c] sm:$0xf] %vm1049_vm10, %v1016_v5  ;;  %v1014_v10 = vpop.permute.xlu0 %1013  ;;  %v1686_v7 = vsel %vm2700_vm5, %v2253_v60, %v1685_v36  ;;  %v2169_v36 = vld [vmem:[%s2615_s10 + $0x48] sm:$0xe] }
 0x129   : > { %1056 = vst.msk [vmem:[#allocation2 + $0x18] sm:$0xf] %vm1049_vm10, %v1014_v10  ;;  %1027 = vrot.lane.b32.xlu2 %v976_v13, %s2510_s20  ;;  %v1521_v10 = vshll.u32 %v2222_v1, 16  ;;  %v1487_v13 = vshll.u32 %v2218_v4, 16  ;;  %v1155_v41 = vsel %vm2700_vm5, %v1153_v20, %v1154_v21  ;;  %v2183_v43 = vrot.slane %v2169_v36, 9 }
 0x12a   : > { %v2223_v4 = vld [vmem:[%s2615_s10 + $0x6c] sm:$0xf] }
 0x12b   : > { %v1269_v26 = vpop.permute.xlu2 %1268  ;;  %v1523_v19 = vrot.slane %v1521_v10, 5  ;;  %v1489_v22 = vrot.slane %v1487_v13, 5  ;;  %v2241_v13 = vld [vmem:[%s2615_s10 + $0x54] sm:$0xe] }
 0x12c   : > { %v2255_v17 = vrot.slane %v2241_v13, 9 }
 0x12d   : > { %1561 = vrot.lane.b32.xlu1 %v1442_v15, %s2512_s24  ;;  %v1707_v15 = vsel %vm2700_vm5, %v2256_v63, %v1706_v54  ;;  %v1152_v54 = vsel %vm2700_vm5, %v2183_v43, %v1151_v12  ;;  %v2176_v63 = vld [vmem:[%s2615_s10 + $0x64] sm:$0xf]  ;;  %v1529_v12 = vshll.u32 %v2223_v4, 16 }
 0x12e   : > { %1196 = vrot.lane.b32.xlu0 %v1162_v18, %s2511_s21  ;;  %v1519_v18 = vrot.slane %v1518_v8, 4  ;;  %v2197_v8 = vld [vmem:[%s2615_s10 + $0x58] sm:$0xf] }
 0x12f   : > { %v1022_v28 = vpop.permute.xlu1 %1021  ;;  %v1531_v21 = vrot.slane %v1529_v12, 5 }
 0x130   : > { %1060 = vst.msk [vmem:[#allocation2 + $0x28] sm:$0xf] %vm1049_vm10, %v1022_v28  ;;  %v1020_v30 = vpop.permute.xlu0 %1019  ;;  %v2219_v28 = vld [vmem:[%s2615_s10 + $0x5c] sm:$0x1]  ;;  %v1524_v34 = vsel %vm2626_vm2, %v1519_v18, %v1523_v19 }
 0x131   : > { %1059 = vst.msk [vmem:[#allocation2 + $0x24] sm:$0xf] %vm1049_vm10, %v1020_v30  ;;  %1194 = vrot.lane.b32.xlu2 %v1159_v33, %s2511_s21  ;;  %v1483_v30 = vrot.slane %v1481_v9, 5  ;;  %v1497_v37 = vshll.u32 %v2219_v28, 16  ;;  %v2224_v28 = vld [vmem:[%s2615_s10 + $0x70] sm:$0xf] }
 0x133   : > { %v1552_v46 = vpop.permute.xlu2 %1551  ;;  %v1484_v42 = vor.u32 %v1483_v30, %v1480_v29  ;;  %v1499_v45 = vrot.slane %v1497_v37, 5 }
 0x135   : > { %1294 = vrot.lane.b32.xlu1 %v2199_v35, %s2513_s27  ;;  %v1494_v35 = vor.u32 %v1493_v24, %v1489_v22  ;;  %v1485_v50 = vrot.slane %v1484_v42, 4  ;;  %v2153_v24 = vld [vmem:[%s2615_s10 + $0x68] sm:$0x1] }
 0x136   : > { %1292 = vrot.lane.b32.xlu0 %v2198_v40, %s2513_s27  ;;  %v981_v40 = vshll.u32 %v2151_v32, 16 }
 0x137   : > { %v1173_v47 = vpop.permute.xlu1 %1172  ;;  %v1495_v44 = vrot.slane %v1494_v35, 4  ;;  %v1490_v59 = vsel %vm2626_vm2, %v1485_v50, %v1489_v22  ;;  %v1535_v35 = vshll.u32 %v2224_v28, 16 }
 0x138   : > { %1220 = vst.msk [vmem:[#allocation2 + $0x4] sm:$0xf] %vm1218_vm12, %v1173_v47  ;;  %v1171_v51 = vpop.permute.xlu0 %1170  ;;  %v983_v47 = vrot.slane %v981_v40, 5 }
 0x139   : > { %1219 = vst.msk [vmem:[#allocation2] sm:$0xf] %vm1218_vm12, %v1171_v51  ;;  %1563 = vrot.lane.b32.xlu2 %v1452_v52, %s2512_s24  ;;  %v2152_v51 = vld [vmem:[%s2615_s10 + $0x64] sm:$0xf]  ;;  %v1500_v55 = vsel %vm2626_vm2, %v1495_v44, %v1499_v45  ;;  %v2248_v44 = vld [vmem:[%s2615_s10 + $0x70] sm:$0xf] }
 0x13a   : > { %1317 = vst.msk [vmem:[#allocation2] sm:$0xf] %vm1316_vm13, %v1269_v26  ;;  %v987_v57 = vshll.u32 %v2152_v51, 16  ;;  %v991_v6 = vshrl.u32 %v2152_v51, 16  ;;  %v1713_v50 = vrot.slane %v2248_v44, 5 }
 0x13b   : > { %v1179_v0 = vpop.permute.xlu2 %1178  ;;  %v2201_v51 = vld [vmem:[%s2615_s10 + $0x70] sm:$0xf] }
 0x13c   : > { %1223 = vst.msk [vmem:[#allocation2 + $0x10] sm:$0xf] %vm1218_vm12, %v1179_v0  ;;  %v989_v62 = vrot.slane %v987_v57, 5  ;;  %v993_v9 = vrot.slane %v991_v6, 4  ;;  %v2225_v57 = vld [vmem:[%s2615_s10 + $0x74] sm:$0x1] }
 0x13d   : > { %1573 = vrot.lane.b32.xlu1 %v1514_v53, %s2512_s24  ;;  %v2242_v53 = vld [vmem:[%s2615_s10 + $0x58] sm:$0xf] }
 0x13e   : > { %1732 = vrot.lane.b32.xlu0 %v1689_v56, %s2514_s28  ;;  %v1699_v60 = vrot.slane %v2242_v53, 5  ;;  %v994_v32 = vor.u32 %v993_v9, %v989_v62 }
 0x13f   : > { %v1550_v2 = vpop.permute.xlu1 %1549 }
 0x140   : > { %1598 = vst.msk [vmem:[#allocation2] sm:$0xf] %vm1597_vm14, %v1550_v2  ;;  %v1271_v5 = vpop.permute.xlu0 %1270  ;;  %v1701_v2 = vrot.slane %v1699_v60, 4  ;;  %v1700_v30 = vsel %vm2700_vm5, %v2255_v17, %v1699_v60 }
 0x141   : > { %1318 = vst.msk [vmem:[#allocation2 + $0x4] sm:$0xf] %vm1316_vm13, %v1271_v5  ;;  %1730 = vrot.lane.b32.xlu2 %v1686_v7, %s2514_s28  ;;  %v1165_v7 = vrot.slane %v2176_v63, 5  ;;  %v1545_v63 = vshll.u32 %v2225_v57, 16 }
 0x142   : > { %1599 = vst.msk [vmem:[#allocation2 + $0x4] sm:$0xf] %vm1597_vm14, %v1552_v46  ;;  %v980_v46 = vrot.slane %v978_v39, 4  ;;  %v1703_v14 = vsel %vm2700_vm5, %v1701_v2, %v1702_v3  ;;  %v995_v39 = vrot.slane %v994_v32, 4 }
 0x143   : > { %v1279_v26 = vpop.permute.xlu2 %1278  ;;  %v1167_v18 = vrot.slane %v1165_v7, 4  ;;  %v1547_v3 = vrot.slane %v1545_v63, 5 }
 0x144   : > { %v984_v56 = vor.u32 %v983_v47, %v980_v46  ;;  %v1539_v47 = vshrl.u32 %v2224_v28, 16 }
 0x145   : > { %1744 = vrot.lane.b32.xlu1 %v1710_v11, %s2514_s28  ;;  %v1526_v11 = vshrl.u32 %v2223_v4, 16 }
 0x146   : > { %1742 = vrot.lane.b32.xlu0 %v1707_v15, %s2514_s28  ;;  %v985_v58 = vrot.slane %v984_v56, 4  ;;  %v2177_v15 = vld [vmem:[%s2615_s10 + $0x68] sm:$0x1]  ;;  %v1541_v53 = vrot.slane %v1539_v47, 4 }
 0x147   : > { %v1721_v27 = vpop.permute.xlu1 %1720  ;;  %v1168_v19 = vrot.slane %v2177_v15, 5  ;;  %v1528_v20 = vrot.slane %v1526_v11, 4 }
 0x148   : > { %1768 = vst.msk [vmem:[#allocation2 + $0x4] sm:$0xf] %vm1766_vm15, %v1721_v27  ;;  %v1719_v33 = vpop.permute.xlu0 %1718  ;;  %v990_v10 = vsel %vm2626_vm2, %v985_v58, %v989_v62  ;;  %v2185_v27 = vrot.slane %v2175_v16, 9  ;;  %v2200_v58 = vld [vmem:[%s2615_s10 + $0x6c] sm:$0xf] }
 0x149   : > { %1767 = vst.msk [vmem:[#allocation2] sm:$0xf] %vm1766_vm15, %v1719_v33  ;;  %1575 = vrot.lane.b32.xlu2 %v1524_v34, %s2512_s24  ;;  %v997_v33 = vshll.u32 %v2153_v24, 16  ;;  %v1532_v34 = vor.u32 %v1531_v21, %v1528_v20 }
 0x14a   : > { %v1166_v37 = vsel %vm2700_vm5, %v2185_v27, %v1165_v7 }
 0x14b   : > { %v1727_v48 = vpop.permute.xlu2 %1726  ;;  %v999_v40 = vrot.slane %v997_v33, 5  ;;  %v1533_v36 = vrot.slane %v1532_v34, 4 }
 0x14d   : > { %1288 = vrot.lane.b32.xlu1 %v2196_v31, %s2513_s27  ;;  %v1169_v31 = vsel %vm2700_vm5, %v1167_v18, %v1168_v19 }
 0x14e   : > { %1192 = vrot.lane.b32.xlu0 %v1155_v41, %s2511_s21  ;;  %v1537_v41 = vrot.slane %v1535_v35, 5 }
 0x14f   : > { %v1277_v49 = vpop.permute.xlu1 %1276 }
 0x150   : > { %1321 = vst.msk [vmem:[#allocation2 + $0x10] sm:$0xf] %vm1316_vm13, %v1277_v49  ;;  %v1181_v38 = vpop.permute.xlu0 %1180  ;;  %v2311_v52 = vld [vmem:[#allocation2] sm:$0xff]  ;;  %v1538_v49 = vsel %vm2626_vm2, %v1533_v36, %v1537_v41  ;;  %v1542_v62 = vor.u32 %v1541_v53, %v1537_v41 }
 0x151   : > { %1224 = vst.msk [vmem:[#allocation2 + $0x14] sm:$0xf] %vm1218_vm12, %v1181_v38  ;;  %2298 = vmatmul.msk.bf16.vlgmr.msra.gmra.mxu0 %vm1863_vm0, %v2311_v52  ;;  %1190 = vrot.lane.b32.xlu2 %v1152_v54, %s2511_s21  ;;  %v2249_v38 = vld [vmem:[%s2615_s10 + $0x74] sm:$0x1]  ;;  %v2247_v52 = vld [vmem:[%s2615_s10 + $0x6c] sm:$0xe] }
 0x152   : > { %1322 = vst.msk [vmem:[#allocation2 + $0x14] sm:$0xf] %vm1316_vm13, %v1279_v26  ;;  %v1715_v54 = vrot.slane %v1713_v50, 4  ;;  %v2257_v60 = vrot.slane %v2247_v52, 9  ;;  %v1543_v2 = vrot.slane %v1542_v62, 4  ;;  %s2431_s10 = scalar_lea.hbm %s3408_s3, 32 }
 0x153   : > { %v1177_v0 = vpop.permute.xlu2 %1176 }
 0x154   : > { %1222 = vst.msk [vmem:[#allocation2 + $0xc] sm:$0xf] %vm1218_vm12, %v1177_v0  ;;  %v1548_v7 = vsel %vm2626_vm2, %v1543_v2, %v1547_v3 }
 0x155   : > { %1571 = vrot.lane.b32.xlu1 %v1500_v55, %s2512_s24  ;;  %v1716_v55 = vrot.slane %v2249_v38, 5 }
 0x156   : > { %1569 = vrot.lane.b32.xlu0 %v1490_v59, %s2512_s24 }
 0x157   : > { %v1560_v1 = vpop.permute.xlu1 %1559  ;;  %v1717_v0 = vsel %vm2700_vm5, %v1715_v54, %v1716_v55 }
 0x158   : > { %1603 = vst.msk [vmem:[#allocation2 + $0x14] sm:$0xf] %vm1597_vm14, %v1560_v1  ;;  %v1558_v5 = vpop.permute.xlu0 %1557  ;;  %v1714_v1 = vsel %vm2700_vm5, %v2257_v60, %v1713_v50 }
 0x159   : > { %1602 = vst.msk [vmem:[#allocation2 + $0x10] sm:$0xf] %vm1597_vm14, %v1558_v5  ;;  %1290 = vrot.lane.b32.xlu2 %v2197_v8, %s2513_s27 }
 0x15a   : > { %1771 = vst.msk [vmem:[#allocation2 + $0x10] sm:$0xf] %vm1766_vm15, %v1727_v48  ;;  %v1000_v48 = vsel %vm2626_vm2, %v995_v39, %v999_v40 }
 0x15b   : > { %v1187_v22 = vpop.permute.xlu2 %1186 }
 0x15c   : > { %1227 = vst.msk [vmem:[#allocation2 + $0x20] sm:$0xf] %vm1218_vm12, %v1187_v22 }
 0x15d   : > { %1029 = vrot.lane.b32.xlu1 %v990_v10, %s2510_s20 }
 0x15e   : > { %1740 = vrot.lane.b32.xlu0 %v1703_v14, %s2514_s28 }
 0x15f   : > { %v1175_v26 = vpop.permute.xlu1 %1174 }
 0x160   : > { %1221 = vst.msk [vmem:[#allocation2 + $0x8] sm:$0xf] %vm1218_vm12, %v1175_v26  ;;  %v1729_v29 = vpop.permute.xlu0 %1728 }
 0x161   : > { %1772 = vst.msk [vmem:[#allocation2 + $0x14] sm:$0xf] %vm1766_vm15, %v1729_v29  ;;  %1738 = vrot.lane.b32.xlu2 %v1700_v30, %s2514_s28 }
 0x163   : > { %v1556_v42 = vpop.permute.xlu2 %1555 }
 0x165   : > { %1200 = vrot.lane.b32.xlu1 %v1169_v31, %s2511_s21 }
 0x166   : > { %1198 = vrot.lane.b32.xlu0 %v1166_v37, %s2511_s21 }
 0x167   : > { %v1275_v43 = vpop.permute.xlu1 %1274 }
 0x168   : > { %1320 = vst.msk [vmem:[#allocation2 + $0xc] sm:$0xf] %vm1316_vm13, %v1275_v43  ;;  %v1273_v45 = vpop.permute.xlu0 %1272  ;;  %v2313_v46 = vld [vmem:[#allocation2 + $0x10] sm:$0xff]  ;;  %v3332_v43 = vld [vmem:[%s3407_s2] ss:$0 sm:$0xff] }
 0x169   : > { %1319 = vst.msk [vmem:[#allocation2 + $0x8] sm:$0xf] %vm1316_vm13, %v1273_v45  ;;  %2300 = vmatmul.msk.bf16.vlgmr.msra.gmra.mxu1 %vm1863_vm0, %v2313_v46  ;;  %1031 = vrot.lane.b32.xlu2 %v1000_v48, %s2510_s20  ;;  %s2308_s20 = sshll.u32 %s2608_s5, 3 }
 0x16a   : > { %1601 = vst.msk [vmem:[#allocation2 + $0xc] sm:$0xf] %vm1597_vm14, %v1556_v42 }
 0x16b   : > { %v1723_v56 = vpop.permute.xlu2 %1722 }
 0x16d   : > { %1577 = vrot.lane.b32.xlu1 %v1538_v49, %s2512_s24 }
 0x16e   : > { %1298 = vrot.lane.b32.xlu0 %v2201_v51, %s2513_s27 }
 0x16f   : > { %v1554_v59 = vpop.permute.xlu1 %1553 }
 0x170   : > { %1600 = vst.msk [vmem:[#allocation2 + $0x8] sm:$0xf] %vm1597_vm14, %v1554_v59  ;;  %v1189_v61 = vpop.permute.xlu0 %1188 }
 0x171   : > { %1228 = vst.msk [vmem:[#allocation2 + $0x24] sm:$0xf] %vm1218_vm12, %v1189_v61  ;;  %1296 = vrot.lane.b32.xlu2 %v2200_v58, %s2513_s27  ;;  %s2019_s27 = scalar_lea.hbm %s3408_s3, %s2308_s20 }
 0x172   : > { %1769 = vst.msk [vmem:[#allocation2 + $0x8] sm:$0xf] %vm1766_vm15, %v1723_v56  ;;  %s2023_s4 = sshll.u32 %s2019_s27, 4  ;;  %s2024_s4 = int_to_ptr.hbm [resolvable:$true] %s2023_s4 }
 0x173   : > { %v1568_v4 = vpop.permute.xlu2 %1567  ;;  %s2425_s7 = sshra.s32 %s2024_s4, 4  ;;  %s2426_s7 = int_to_ptr.hbm [resolvable:$true] %s2425_s7 }
 0x174   : > { %s2427_s8 = scalar_lea.hbm %s2426_s7, 8  ;;  %p2432_p2 = scmp.lt.s32.totalorder %s2426_s7, %s3408_s3 }
 0x175   : > { %1748 = vrot.lane.b32.xlu1 %v1717_v0, %s2514_s28  ;;  %p2428_p13 = scmp.ne.s32.totalorder %s2426_s7, %s2427_s8  ;;  %p2433_p4 = scmp.lt.s32.totalorder %s2431_s10, %s2427_s8 }
 0x176   : > { %1746 = vrot.lane.b32.xlu0 %v1714_v1, %s2514_s28  ;;  %s187_s28 = scalar_lea.vmem [#allocation3], %s2103_s16 }
 0x177   : > { %v1287_v5 = vpop.permute.xlu1 %1286  ;;  %s2021_s29 = sshll.u32 %s187_s28, 4  ;;  %p2429_p0 = pnand %p2428_p13, %p2586_p3  ;;  %s2022_s29 = int_to_ptr.vmem [resolvable:$true] %s2021_s29 }
 0x178   : > { %1326 = vst.msk [vmem:[#allocation2 + $0x24] sm:$0xf] %vm1316_vm13, %v1287_v5  ;;  %v1285_v6 = vpop.permute.xlu0 %1284  ;;  %p2434_p5 = por %p2433_p4, %p2432_p2 }
 0x179   : > { %1325 = vst.msk [vmem:[#allocation2 + $0x20] sm:$0xf] %vm1316_vm13, %v1285_v6  ;;  %1579 = vrot.lane.b32.xlu2 %v1548_v7, %s2512_s24  ;;  %p2430_p1 = pneg %p2429_p0 }
 0x17a   : > { %1607 = vst.msk [vmem:[#allocation2 + $0x24] sm:$0xf] %vm1597_vm14, %v1568_v4 }
 0x17b   : > { %v1183_v23 = vpop.permute.xlu2 %1182  ;;  %p2435_p6 = pnand %p2434_p5, %p2430_p1 }
 0x17c   : > { %1225 = vst.msk [vmem:[#allocation2 + $0x18] sm:$0xf] %vm1218_vm12, %v1183_v23 }
 0x17f   : > { %v1566_v8 = vpop.permute.xlu1 %1565 }
 0x180   : > { %1606 = vst.msk [vmem:[#allocation2 + $0x20] sm:$0xf] %vm1597_vm14, %v1566_v8  ;;  %v1725_v10 = vpop.permute.xlu0 %1724 }
 0x181   : > { %1770 = vst.msk [vmem:[#allocation2 + $0xc] sm:$0xf] %vm1766_vm15, %v1725_v10 }
 0x183   : > { %v1028_v11 = vpop.permute.xlu2 %1027 }
 0x184   : > { %1063 = vst.msk [vmem:[#allocation2 + $0x34] sm:$0xf] %vm1049_vm10, %v1028_v11 }
 0x187   : > { %v1737_v12 = vpop.permute.xlu1 %1736 }
 0x188   : > { %1776 = vst.msk [vmem:[#allocation2 + $0x24] sm:$0xf] %vm1766_vm15, %v1737_v12  ;;  %v1735_v25 = vpop.permute.xlu0 %1734  ;;  %v2312_v13 = vld [vmem:[#allocation2 + $0x8] sm:$0xff] }
 0x189   : > { %1775 = vst.msk [vmem:[#allocation2 + $0x20] sm:$0xf] %vm1766_vm15, %v1735_v25  ;;  %2299 = vmatmul.msk.bf16.gmra.mxu0 %vm1863_vm0, %v2312_v13 }
 0x18b   : > { %v1195_v14 = vpop.permute.xlu2 %1194 }
 0x18f   : > { %v1026_v15 = vpop.permute.xlu1 %1025 }
 0x190   : > { %1062 = vst.msk [vmem:[#allocation2 + $0x30] sm:$0xf] %vm1049_vm10, %v1026_v15  ;;  %v1185_v16 = vpop.permute.xlu0 %1184  ;;  %v2315_v17 = vld [vmem:[#allocation2 + $0x20] sm:$0xff] }
 0x191   : > { %1226 = vst.msk [vmem:[#allocation2 + $0x1c] sm:$0xf] %vm1218_vm12, %v1185_v16  ;;  %2302 = vmatmul.msk.bf16.vlgmr.msra.gmra.mxu2 %vm1863_vm0, %v2315_v17 }
 0x192   : > { %1231 = vst.msk [vmem:[#allocation2 + $0x30] sm:$0xf] %vm1218_vm12, %v1195_v14 }
 0x193   : > { %v1564_v9 = vpop.permute.xlu2 %1563 }
 0x197   : > { %v1283_v18 = vpop.permute.xlu1 %1282 }
 0x198   : > { %1324 = vst.msk [vmem:[#allocation2 + $0x1c] sm:$0xf] %vm1316_vm13, %v1283_v18  ;;  %v1281_v19 = vpop.permute.xlu0 %1280 }
 0x199   : > { %1323 = vst.msk [vmem:[#allocation2 + $0x18] sm:$0xf] %vm1316_vm13, %v1281_v19 }
 0x19a   : > { %1605 = vst.msk [vmem:[#allocation2 + $0x1c] sm:$0xf] %vm1597_vm14, %v1564_v9 }
 0x19b   : > { %v1731_v20 = vpop.permute.xlu2 %1730 }
 0x19f   : > { %v1562_v21 = vpop.permute.xlu1 %1561 }
 0x1a0   : > { %1604 = vst.msk [vmem:[#allocation2 + $0x18] sm:$0xf] %vm1597_vm14, %v1562_v21  ;;  %v1197_v22 = vpop.permute.xlu0 %1196 }
 0x1a1   : > { %1232 = vst.msk [vmem:[#allocation2 + $0x34] sm:$0xf] %vm1218_vm12, %v1197_v22 }
 0x1a2   : > { %1773 = vst.msk [vmem:[#allocation2 + $0x18] sm:$0xf] %vm1766_vm15, %v1731_v20 }
 0x1a3   : > { %v1576_v24 = vpop.permute.xlu2 %1575 }
 0x1a7   : > { %v1295_v26 = vpop.permute.xlu1 %1294 }
 0x1a8   : > { %1330 = vst.msk [vmem:[#allocation2 + $0x34] sm:$0xf] %vm1316_vm13, %v1295_v26  ;;  %v1293_v27 = vpop.permute.xlu0 %1292 }
 0x1a9   : > { %1329 = vst.msk [vmem:[#allocation2 + $0x30] sm:$0xf] %vm1316_vm13, %v1293_v27 }
 0x1aa   : > { %1611 = vst.msk [vmem:[#allocation2 + $0x34] sm:$0xf] %vm1597_vm14, %v1576_v24 }
 0x1ab   : > { %v1191_v28 = vpop.permute.xlu2 %1190 }
 0x1ac   : > { %1229 = vst.msk [vmem:[#allocation2 + $0x28] sm:$0xf] %vm1218_vm12, %v1191_v28 }
 0x1af   : > { %v1574_v29 = vpop.permute.xlu1 %1573 }
 0x1b0   : > { %1610 = vst.msk [vmem:[#allocation2 + $0x30] sm:$0xf] %vm1597_vm14, %v1574_v29  ;;  %v1733_v30 = vpop.permute.xlu0 %1732 }
 0x1b1   : > { %1774 = vst.msk [vmem:[#allocation2 + $0x1c] sm:$0xf] %vm1766_vm15, %v1733_v30 }
 0x1b3   : > { %v1291_v32 = vpop.permute.xlu2 %1290 }
 0x1b7   : > { %v1745_v33 = vpop.permute.xlu1 %1744 }
 0x1b8   : > { %1780 = vst.msk [vmem:[#allocation2 + $0x34] sm:$0xf] %vm1766_vm15, %v1745_v33  ;;  %v1743_v31 = vpop.permute.xlu0 %1742  ;;  %v2314_v34 = vld [vmem:[#allocation2 + $0x18] sm:$0xff] }
 0x1b9   : > { %1779 = vst.msk [vmem:[#allocation2 + $0x30] sm:$0xf] %vm1766_vm15, %v1743_v31  ;;  %2301 = vmatmul.msk.bf16.gmra.mxu1 %vm1863_vm0, %v2314_v34 }
 0x1bb   : > { %v1739_v35 = vpop.permute.xlu2 %1738 }
 0x1bf   : > { %v1289_v37 = vpop.permute.xlu1 %1288 }
 0x1c0   : > { %1327 = vst.msk [vmem:[#allocation2 + $0x28] sm:$0xf] %vm1316_vm13, %v1289_v37  ;;  %v1193_v39 = vpop.permute.xlu0 %1192  ;;  %v2317_v40 = vld [vmem:[#allocation2 + $0x30] sm:$0xff] }
 0x1c1   : > { %1230 = vst.msk [vmem:[#allocation2 + $0x2c] sm:$0xf] %vm1218_vm12, %v1193_v39  ;;  %2304 = vmatmul.msk.bf16.vlgmr.msra.gmra.mxu3 %vm1863_vm0, %v2317_v40 }
 0x1c2   : > { %1328 = vst.msk [vmem:[#allocation2 + $0x2c] sm:$0xf] %vm1316_vm13, %v1291_v32 }
 0x1c3   : > { %v1032_v36 = vpop.permute.xlu2 %1031 }
 0x1c4   : > { %1065 = vst.msk [vmem:[#allocation2 + $0x3c] sm:$0xf] %vm1049_vm10, %v1032_v36 }
 0x1c7   : > { %v1572_v41 = vpop.permute.xlu1 %1571 }
 0x1c8   : > { %1609 = vst.msk [vmem:[#allocation2 + $0x2c] sm:$0xf] %vm1597_vm14, %v1572_v41  ;;  %v1570_v42 = vpop.permute.xlu0 %1569 }
 0x1c9   : > { %1608 = vst.msk [vmem:[#allocation2 + $0x28] sm:$0xf] %vm1597_vm14, %v1570_v42 }
 0x1ca   : > { %1777 = vst.msk [vmem:[#allocation2 + $0x28] sm:$0xf] %vm1766_vm15, %v1739_v35 }
 0x1cb   : > { %v1297_v50 = vpop.permute.xlu2 %1296 }
 0x1ce   : > { %v1901_v45 = vpop.f32.mrf.mxu0 }
 0x1cf   : > { %v1030_v44 = vpop.permute.xlu1 %1029  ;;  %v1902_v47 = vadd.f32 %v3332_v43, %v1901_v45 }
 0x1d0   : > { %1064 = vst.msk [vmem:[#allocation2 + $0x38] sm:$0xf] %vm1049_vm10, %v1030_v44  ;;  %v1741_v46 = vpop.permute.xlu0 %1740 }
 0x1d1   : > { %1778 = vst.msk [vmem:[#allocation2 + $0x2c] sm:$0xf] %vm1766_vm15, %v1741_v46  ;;  %v1941_v48 = vmul.f32 0.2, %v1902_v47 }
 0x1d3   : > { %v1957_v49 = vmax.f32 %v1902_v47, %v1941_v48  ;;  %v1580_v59 = vpop.permute.xlu2 %1579 }
 0x1d5   : > { %1973 = vxpose.xlu2.b32.start [1/16] (narrow) %v1957_v49, 8 }
 0x1d6   : > { %v1903_v38 = vpop.f32.mrf.mxu0 }
 0x1d7   : > { %v1201_v51 = vpop.permute.xlu1 %1200  ;;  %v1904_v53 = vadd.f32 %v3332_v43, %v1903_v38 }
 0x1d8   : > { %1234 = vst.msk [vmem:[#allocation2 + $0x3c] sm:$0xf] %vm1218_vm12, %v1201_v51  ;;  %v1199_v52 = vpop.permute.xlu0 %1198  ;;  %v2316_v54 = vld [vmem:[#allocation2 + $0x28] sm:$0xff] }
 0x1d9   : > { %1233 = vst.msk [vmem:[#allocation2 + $0x38] sm:$0xf] %vm1218_vm12, %v1199_v52  ;;  %v1942_v55 = vmul.f32 0.2, %v1904_v53  ;;  %2303 = vmatmul.msk.bf16.gmra.mxu2 %vm1863_vm0, %v2316_v54 }
 0x1da   : > { %1331 = vst.msk [vmem:[#allocation2 + $0x38] sm:$0xf] %vm1316_vm13, %v1297_v50 }
 0x1db   : > { %v1958_v56 = vmax.f32 %v1904_v53, %v1942_v55 }
 0x1dd   : > { %1974 = vxpose.xlu2.b32.cont [2/16] (narrow) %v1958_v56, 8 }
 0x1df   : > { %v1578_v57 = vpop.permute.xlu1 %1577 }
 0x1e0   : > { %1612 = vst.msk [vmem:[#allocation2 + $0x38] sm:$0xf] %vm1597_vm14, %v1578_v57  ;;  %v1299_v60 = vpop.permute.xlu0 %1298 }
 0x1e1   : > { %1332 = vst.msk [vmem:[#allocation2 + $0x3c] sm:$0xf] %vm1316_vm13, %v1299_v60 }
 0x1e2   : > { %1613 = vst.msk [vmem:[#allocation2 + $0x3c] sm:$0xf] %vm1597_vm14, %v1580_v59 }
 0x1e6   : > { %v1911_v3 = vpop.f32.mrf.mxu1 }
 0x1e7   : > { %v1749_v61 = vpop.permute.xlu1 %1748  ;;  %v1912_v7 = vadd.f32 %v3332_v43, %v1911_v3 }
 0x1e8   : > { %1782 = vst.msk [vmem:[#allocation2 + $0x3c] sm:$0xf] %vm1766_vm15, %v1749_v61  ;;  %v1747_v58 = vpop.permute.xlu0 %1746 }
 0x1e9   : > { %1781 = vst.msk [vmem:[#allocation2 + $0x38] sm:$0xf] %vm1766_vm15, %v1747_v58  ;;  %v1945_v8 = vmul.f32 0.2, %v1912_v7 }
 0x1eb   : > { %v1961_v11 = vmax.f32 %v1912_v7, %v1945_v8 }
 0x1ee   : > { %v1913_v10 = vpop.f32.mrf.mxu1 }
 0x1ef   : > { %v1914_v12 = vadd.f32 %v3332_v43, %v1913_v10 }
 0x1f0   : > { %v2318_v62 = vld [vmem:[#allocation2 + $0x38] sm:$0xff] }
 0x1f1   : > { %2305 = vmatmul.msk.bf16.gmra.mxu3 %vm1863_vm0, %v2318_v62  ;;  %v1946_v25 = vmul.f32 0.2, %v1914_v12 }
 0x1f3   : > { %v1962_v13 = vmax.f32 %v1914_v12, %v1946_v25 }
 0x206   : > { %v1906_v63 = vpop.f32.mrf.mxu0 }
 0x207   : > { %v1907_v0 = vadd.f32 %v3332_v43, %v1906_v63 }
 0x209   : > { %v1943_v1 = vmul.f32 0.2, %v1907_v0 }
 0x20b   : > { %v1959_v2 = vmax.f32 %v1907_v0, %v1943_v1 }
 0x20d   : > { %1975 = vxpose.xlu2.b32.cont [3/16] (narrow) %v1959_v2, 8 }
 0x20e   : > { %v1908_v4 = vpop.f32.mrf.mxu0 }
 0x20f   : > { %v1909_v5 = vadd.f32 %v3332_v43, %v1908_v4 }
 0x211   : > { %v1944_v6 = vmul.f32 0.2, %v1909_v5 }
 0x213   : > { %v1960_v23 = vmax.f32 %v1909_v5, %v1944_v6 }
 0x214   : > { %v1921_v9 = vpop.f32.mrf.mxu2 }
 0x215   : > { %1976 = vxpose.xlu2.b32.cont [4/16] (narrow) %v1960_v23, 8  ;;  %v1922_v21 = vadd.f32 %v3332_v43, %v1921_v9 }
 0x217   : > { %v1949_v24 = vmul.f32 0.2, %v1922_v21 }
 0x219   : > { %v1965_v27 = vmax.f32 %v1922_v21, %v1949_v24 }
 0x21c   : > { %v1923_v26 = vpop.f32.mrf.mxu2 }
 0x21d   : > { %1977 = vxpose.xlu2.b32.cont [5/16] (narrow) %v1961_v11, 8  ;;  %v1924_v28 = vadd.f32 %v3332_v43, %v1923_v26 }
 0x21f   : > { %v1950_v29 = vmul.f32 0.2, %v1924_v28 }
 0x221   : > { %v1966_v30 = vmax.f32 %v1924_v28, %v1950_v29 }
 0x225   : > { %1978 = vxpose.xlu2.b32.cont [6/16] (narrow) %v1962_v13, 8 }
 0x236   : > { %v1916_v14 = vpop.f32.mrf.mxu1 }
 0x237   : > { %v1917_v15 = vadd.f32 %v3332_v43, %v1916_v14 }
 0x239   : > { %v1947_v16 = vmul.f32 0.2, %v1917_v15 }
 0x23b   : > { %v1963_v17 = vmax.f32 %v1917_v15, %v1947_v16 }
 0x23d   : > { %1979 = vxpose.xlu2.b32.cont [7/16] (narrow) %v1963_v17, 8 }
 0x23e   : > { %v1918_v18 = vpop.f32.mrf.mxu1 }
 0x23f   : > { %v1919_v19 = vadd.f32 %v3332_v43, %v1918_v18 }
 0x241   : > { %v1948_v20 = vmul.f32 0.2, %v1919_v19 }
 0x243   : > { %v1964_v22 = vmax.f32 %v1919_v19, %v1948_v20 }
 0x244   : > { %v1931_v35 = vpop.f32.mrf.mxu3 }
 0x245   : > { %1980 = vxpose.xlu2.b32.cont [8/16] (narrow) %v1964_v22, 8  ;;  %v1932_v36 = vadd.f32 %v3332_v43, %v1931_v35 }
 0x247   : > { %v1953_v44 = vmul.f32 0.2, %v1932_v36 }
 0x249   : > { %v1969_v45 = vmax.f32 %v1932_v36, %v1953_v44 }
 0x24c   : > { %v1933_v42 = vpop.f32.mrf.mxu3 }
 0x24d   : > { %1981 = vxpose.xlu2.b32.cont [9/16] (narrow) %v1965_v27, 8  ;;  %v1934_v46 = vadd.f32 %v3332_v43, %v1933_v42 }
 0x24f   : > { %v1954_v48 = vmul.f32 0.2, %v1934_v46 }
 0x251   : > { %v1970_v49 = vmax.f32 %v1934_v46, %v1954_v48 }
 0x255   : > { %1982 = vxpose.xlu2.b32.cont [10/16] (narrow) %v1966_v30, 8 }
 0x25c   : > { %v1926_v32 = vpop.f32.mrf.mxu2 }
 0x25d   : > { %v1927_v33 = vadd.f32 %v3332_v43, %v1926_v32 }
 0x25f   : > { %v1951_v31 = vmul.f32 0.2, %v1927_v33 }
 0x261   : > { %v1967_v34 = vmax.f32 %v1927_v33, %v1951_v31 }
 0x263   : > { %1983 = vxpose.xlu2.b32.cont [11/16] (narrow) %v1967_v34, 8 }
 0x264   : > { %v1928_v37 = vpop.f32.mrf.mxu2 }
 0x265   : > { %v1929_v39 = vadd.f32 %v3332_v43, %v1928_v37 }
 0x267   : > { %v1952_v40 = vmul.f32 0.2, %v1929_v39 }
 0x269   : > { %v1968_v41 = vmax.f32 %v1929_v39, %v1952_v40 }
 0x26b   : > { %1984 = vxpose.xlu2.b32.cont [12/16] (narrow) %v1968_v41, 8 }
 0x273   : > { %1985 = vxpose.xlu2.b32.cont [13/16] (narrow) %v1969_v45, 8 }
 0x274   : > { %v1936_v47 = vpop.f32.mrf.mxu3 }
 0x275   : > { %v1937_v50 = vadd.f32 %v3332_v43, %v1936_v47 }
 0x277   : > { %v1955_v51 = vmul.f32 0.2, %v1937_v50 }
 0x279   : > { %v1971_v52 = vmax.f32 %v1937_v50, %v1955_v51 }
 0x27b   : > { %1986 = vxpose.xlu2.b32.cont [14/16] (narrow) %v1970_v49, 8 }
 0x27c   : > { %v1938_v38 = vpop.f32.mrf.mxu3 }
 0x27d   : > { %v1939_v53 = vadd.f32 %v3332_v43, %v1938_v38 }
 0x27f   : > { %v1956_v54 = vmul.f32 0.2, %v1939_v53 }
 0x281   : > { %v1972_v55 = vmax.f32 %v1939_v53, %v1956_v54 }
 0x283   : > { %1987 = vxpose.xlu2.b32.cont [15/16] (narrow) %v1971_v52, 8 }
 0x28b   : > { %1988 = vxpose.xlu2.b32.end [16/16] (narrow) %v1972_v55, 8 }
 0x2ac   : > { %v1989_v56 = vpop.trf.xlu2 }
 0x2ad   : > { %2005 = vst [vmem:[%s187_s28] sm:$0xff] %v1989_v56 }
 0x2ae   : > { %2438 = shalt.err (!%p2435_p6)
}
 0x2af   : > { %2331 = dma.vmem_to_hbm [thread:$0]  (%p2586_p3), %s2022_s29, 128, %s2024_s4, %s2007_s6  }
 0x2b0 PF: > { %p2337_p7 = scmp.ge.s32.totalorder %s2505_s19, 2  ;;  %s2035_s15 = sand.u32 1, %s2477_s12  }
 0x2b1   : > { %s2036_s20 = scalar_lea.sflag [#allocation4], %s2035_s15 }
 0x2b2   : > { %p2334_p9 = pnand %p2337_p7, %p2595_p8 }
 0x2b4   : > { %p2335_p10 = pneg %p2334_p9 }
 0x2b6   : > { %2472 = dma.done.wait (%p2335_p10), %s2036_s20, 128  }
 0x2b7   : > { %2474 = vsyncadd (%p2335_p10), %s2036_s20, 4294967168  ;;  %s16_s19 = sadd.s32 1, %s2505_s19   ;;  %s3415_s12 = smov %s2481_s13 }
 0x2b8   : > { %p13_p11 = scmp.ge.s32.totalorder %s16_s19, 6   ;;  %s3416_s13 = smov %s2485_s14 }
 0x2b9   : > { %s3417_s14 = smov %s2604_s30  ;;  %s3418_s15 = smov %s2497_s17 }
 0x2ba   : > { %s3419_s16 = smov %s2501_s18  ;;  %s3420_s17 = smov %s3423_s22 }
 0x2bb   : > { %s3421_s18 = smov %s3427_s23  ;;  %15 = sbr.rel (!%p13_p11) target bundleno = 5 (0x5), region = 69 }
 0x2c0   :  { %2042 = vsyncpa [#allocation4], 1 }
 0x2c1   :  { %2044 = vsyncpa [#allocation4 + $0x1], 1 }

</bundles_post_ra>
